<compile_context>
chip_gen: v7x
topology: tpu7x:2x2x1
jax: 0.10.0
libtpu: 0.0.40
codegen_flags: <defaults>
</compile_context>

<pallas_src>
import functools

import jax
import jax.numpy as jnp
import numpy as np
from jax import lax
from jax.experimental import pallas as pl
from jax.experimental.pallas import tpu as pltpu


# ---------------------------------------------------------------------------
# Kernel 1: fused upsample(2x nearest) + 3x3 conv + bias as FOUR per-parity
#           2x2 convs (K = 4*Cin each) so the MXU never multiplies the
#           structural zeros of the fused kernel (36 -> 16 MACs per output).
#           Also emits per-tile BatchNorm partial statistics from the f32 acc.
# ---------------------------------------------------------------------------
def _up_conv_kernel(*refs, halo):
    if halo:
        xa_ref, xb_ref, w_ref, b_ref, o_ref, sum_ref, ssq_ref = refs
        # body rows (TH, W+2, Cin) + 2-row halo (2, W+2, Cin) -> (TH+2, W+2, Cin)
        # Single bf16 assembly copy; building taps straight from xa/xb would
        # materialize MORE bytes (2 of the 3 row offsets still need a splice).
        xp = jnp.concatenate([xa_ref[0], xb_ref[0]], axis=0)
    else:
        xa_ref, w_ref, b_ref, o_ref, sum_ref, ssq_ref = refs
        xp = xa_ref[0]                      # whole padded image (H+2, W+2, Cin)

    th = xp.shape[0] - 2
    wp = xp.shape[1]
    cin = xp.shape[2]
    w = wp - 2

    # Per-parity 2x2-tap im2col + matmul, f32 accumulation on the MXU.
    # Output parity (a, b) of the upsampled image only reads original rows
    # {p-1+a, p+a} / cols {q-1+b, q+b} with pre-combined weights (see wrapper).
    parity_out = []
    for a in range(2):
        for b in range(2):
            taps = []
            for u in range(2):
                for v in range(2):
                    taps.append(xp[a + u:a + u + th, b + v:b + v + w, :])
            patches = jnp.concatenate(taps, axis=-1)             # (TH, W, 4*Cin) bf16
            patches = patches.reshape(th * w, 4 * cin)
            parity_out.append(
                jnp.dot(patches, w_ref[2 * a + b],
                        preferred_element_type=jnp.float32))     # (TH*W, Cout)

    acc = jnp.concatenate(parity_out, axis=-1) + b_ref[...]      # (TH*W, 4*Cout) f32

    o_ref[0] = acc.astype(o_ref.dtype)                           # bf16 writeback

    # BatchNorm partial statistics while the f32 tile is still live (free epilogue).
    sum_ref[0, 0] = jnp.sum(acc, axis=0, keepdims=True)
    ssq_ref[0, 0] = jnp.sum(acc * acc, axis=0, keepdims=True)


# ---------------------------------------------------------------------------
# Kernel 2: tiled, fully parallel normalize (precomputed scale/shift) + ReLU.
#           Reads the bf16 conv intermediate, computes in f32.
# ---------------------------------------------------------------------------
def _bn_relu_kernel(y_ref, scale_ref, shift_ref, o_ref):
    y = y_ref[...].astype(jnp.float32)                           # (1, TR, 4*Cout)
    o_ref[...] = jnp.maximum(y * scale_ref[...] + shift_ref[...], 0.0)


# ---------------------------------------------------------------------------
# generation-aware VMEM budgeting + tiling helpers
# ---------------------------------------------------------------------------
def _vmem_capacity_bytes():
    try:
        return int(pltpu.get_tpu_info().vmem_capacity_bytes)
    except Exception:
        return 64 * 1024 * 1024                     # conservative: v7x per-core VMEM


def _kernel1_vmem_bytes(th, W, cin, cout):
    wp = W + 2
    bf = 2                                          # bf16 bytes
    io = (2 * th * wp * cin * bf                    # body tile (double-buffered)
          + 2 * 2 * wp * cin * bf                   # halo tile
          + 2 * 4 * 4 * cin * cout * bf             # per-parity weights (4,4*Cin,Cout)
          + 2 * th * W * 4 * cout * bf)             # bf16 conv-out tile
    tmp = ((th + 2) * wp * cin * bf                 # assembled body+halo
           + th * W * 4 * cin * bf                  # one parity's patches
           + th * W * cout * 4                      # one parity's f32 result
           + th * W * 4 * cout * 4)                 # packed f32 accumulator
    return io + tmp


def _choose_row_tile(N, H, W, cin, cout, budget, row_tile=None):
    """Pre-upsample rows per conv grid step.  Halo path requires TH | H, TH even
    (halo block starts at an even padded row) and TH*W % 16 == 0 (sublane-aligned
    bf16 output block)."""
    def ok(t):
        return H % t == 0 and t % 2 == 0 and (t * W) % 16 == 0

    if row_tile is not None and ok(row_tile):
        return row_tile, True

    cands = [t for t in range(2, H + 1, 2)
             if ok(t) and t * W <= 8192
             and _kernel1_vmem_bytes(t, W, cin, cout) <= budget]
    if not cands:
        return H, False                             # single whole-image tile fallback
    best = max(cands)
    # Megacore (v7x has 2 TCs): prefer an even total grid if it barely shrinks the tile.
    if (N * (H // best)) % 2 != 0:
        even = [t for t in cands if (N * (H // t)) % 2 == 0]
        if even and 2 * max(even) >= best:
            best = max(even)
    return best, True


def _choose_bn_rows(HW, c4, budget):
    def bytes_for(t):
        # bf16 in (x2 buffers) + f32 out (x2 buffers) + f32 temp
        return 2 * t * c4 * 2 + 2 * t * c4 * 4 + 2 * t * c4 * 4

    best = None
    for t in range(16, HW + 1, 16):
        if HW % t == 0 and bytes_for(t) <= budget:
            best = t
    return best if best is not None else HW


# ---------------------------------------------------------------------------
# wrapper
# ---------------------------------------------------------------------------
def up_conv_forward(x_nchw, w_oihw, conv_bias, bn_gamma, bn_beta,
                    *, eps=1e-5, row_tile=None):
    """Upsample(2, nearest) -> Conv2d(3x3, s=1, p=1, bias) -> BatchNorm2d
    (training-mode batch stats) -> ReLU.  x: (N, Cin, H, W) f32 -> (N, Cout, 2H, 2W)."""
    N, Cin, H, W = x_nchw.shape
    Cout = w_oihw.shape[0]
    C4 = 4 * Cout
    HW = H * W
    Wp = W + 2

    # Generation-aware VMEM budget (v5e/v6e ~96 MiB limit, v7x ~48 MiB).
    vmem_cap = _vmem_capacity_bytes()
    vmem_limit = int(max(min(vmem_cap * 3 // 4, 96 * 1024 * 1024),
                         32 * 1024 * 1024))
    tile_budget = (vmem_limit * 3) // 5             # headroom for compiler scratch

    # glue: NCHW -> NHWC + 1px zero pad + bf16 cast of the SMALL pre-upsample
    # image, fused in one XLA op (halves the input HBM->VMEM DMA).
    x = jnp.transpose(x_nchw, (0, 2, 3, 1)).astype(jnp.bfloat16)
    x_pad = jnp.pad(x, ((0, 0), (1, 1), (1, 1), (0, 0)))         # (N, H+2, W+2, Cin)

    # glue: fold the 2x nearest upsample into PER-PARITY 2x2 conv weights.
    # sel2[a, h, u] = 1 iff original 3x3 row-tap h lands on 2x2 row-tap u for
    # output row parity a (same along columns with parity b).
    w_hwio = jnp.transpose(w_oihw, (2, 3, 1, 0)).astype(jnp.float32)   # (3,3,Cin,Cout)
    sel2 = np.zeros((2, 3, 2), np.float32)
    for a in range(2):
        for h in range(3):
            sel2[a, h, (a + h - 1) // 2 + 1 - a] = 1.0
    sel2 = jnp.asarray(sel2)
    w_par = jnp.einsum("ahu,bwv,hwio->abuvio", sel2, sel2, w_hwio)
    w_par = w_par.reshape(4, 4 * Cin, Cout).astype(jnp.bfloat16)       # parity p = 2a+b
    b_par = jnp.tile(conv_bias.astype(jnp.float32), 4).reshape(1, C4)

    # ---- Pallas kernel 1: fused upsample+conv(+bias) + BN partial stats ------
    TH, use_halo = _choose_row_tile(N, H, W, Cin, Cout, tile_budget, row_tile)
    n_tiles = H // TH if use_halo else 1
    if use_halo:
        in_specs = [
            # body rows [r*TH, r*TH+TH) of the padded image
            pl.BlockSpec((1, TH, Wp, Cin), lambda n, r: (n, r, 0, 0)),
            # 2-row halo [r*TH+TH, r*TH+TH+2) of the same array
            pl.BlockSpec((1, 2, Wp, Cin),
                         lambda n, r: (n, (r + 1) * (TH // 2), 0, 0)),
            pl.BlockSpec((4, 4 * Cin, Cout), lambda n, r: (0, 0, 0)),
            pl.BlockSpec((1, C4), lambda n, r: (0, 0)),
        ]
        operands = (x_pad, x_pad, w_par, b_par)
    else:
        in_specs = [
            pl.BlockSpec((1, H + 2, Wp, Cin), lambda n, r: (n, 0, 0, 0)),
            pl.BlockSpec((4, 4 * Cin, Cout), lambda n, r: (0, 0, 0)),
            pl.BlockSpec((1, C4), lambda n, r: (0, 0)),
        ]
        operands = (x_pad, w_par, b_par)

    conv_out, tile_sum, tile_ssq = pl.pallas_call(
        functools.partial(_up_conv_kernel, halo=use_halo),
        out_shape=(
            jax.ShapeDtypeStruct((N, HW, C4), jnp.bfloat16),     # parity-packed conv
            jax.ShapeDtypeStruct((N, n_tiles, 1, C4), jnp.float32),
            jax.ShapeDtypeStruct((N, n_tiles, 1, C4), jnp.float32),
        ),
        grid_spec=pltpu.PrefetchScalarGridSpec(
            num_scalar_prefetch=0,
            grid=(N, n_tiles),
            in_specs=in_specs,
            out_specs=[
                pl.BlockSpec((1, TH * W, C4), lambda n, r: (n, r, 0)),
                pl.BlockSpec((1, 1, 1, C4), lambda n, r: (n, r, 0, 0)),
                pl.BlockSpec((1, 1, 1, C4), lambda n, r: (n, r, 0, 0)),
            ],
        ),
        compiler_params=pltpu.CompilerParams(
            dimension_semantics=("parallel", "parallel"),
            vmem_limit_bytes=vmem_limit,
        ),
    )(*operands)

    # ---- finalize BatchNorm batch statistics (tiny tensors -> plain JAX) -----
    count = float(N * (2 * H) * (2 * W))
    ch_sum = tile_sum.reshape(N * n_tiles, 4, Cout).sum(axis=(0, 1))
    ch_ssq = tile_ssq.reshape(N * n_tiles, 4, Cout).sum(axis=(0, 1))
    mean = ch_sum / count
    var = ch_ssq / count - mean * mean              # biased variance (training-mode BN)
    scale = bn_gamma.astype(jnp.float32) * lax.rsqrt(var + eps)
    shift = bn_beta.astype(jnp.float32) - mean * scale
    scale4 = jnp.tile(scale, 4).reshape(1, C4)
    shift4 = jnp.tile(shift, 4).reshape(1, C4)

    # ---- Pallas kernel 2: tiled, fully parallel normalize + ReLU -------------
    TR = _choose_bn_rows(HW, C4, tile_budget)
    y = pl.pallas_call(
        _bn_relu_kernel,
        out_shape=jax.ShapeDtypeStruct((N, HW, C4), jnp.float32),
        grid_spec=pltpu.PrefetchScalarGridSpec(
            num_scalar_prefetch=0,
            grid=(N, HW // TR),
            in_specs=[
                pl.BlockSpec((1, TR, C4), lambda n, r: (n, r, 0)),
                pl.BlockSpec((1, C4), lambda n, r: (0, 0)),
                pl.BlockSpec((1, C4), lambda n, r: (0, 0)),
            ],
            out_specs=pl.BlockSpec((1, TR, C4), lambda n, r: (n, r, 0)),
        ),
        compiler_params=pltpu.CompilerParams(
            dimension_semantics=("parallel", "parallel"),
            vmem_limit_bytes=vmem_limit,
        ),
    )(conv_out, scale4, shift4)

    # glue: parity-unpack + NHWC->NCHW as ONE fused XLA transpose pass.
    # TODO(synk): writing NCHW directly from kernel 2 would require an in-kernel
    # channel-major transpose that Mosaic does not lower efficiently.
    y = y.reshape(N, H, W, 2, 2, Cout)               # (n, p, q, a, b, co)
    y = jnp.transpose(y, (0, 5, 1, 3, 2, 4))         # (n, co, p, a, q, b)
    return y.reshape(N, Cout, 2 * H, 2 * W)


# ---------------------------------------------------------------------------
# plain-JAX reference (loose numerical sanity check; kernels use bf16 inputs)
# ---------------------------------------------------------------------------
def _reference_up_conv(x, w, b, gamma, beta, eps=1e-5):
    xu = jnp.repeat(jnp.repeat(x, 2, axis=2), 2, axis=3)
    y = lax.conv_general_dilated(
        xu, w, window_strides=(1, 1), padding=((1, 1), (1, 1)),
        dimension_numbers=("NCHW", "OIHW", "NCHW"),
        precision=lax.Precision.HIGHEST)
    y = y + b[None, :, None, None]
    mean = jnp.mean(y, axis=(0, 2, 3), keepdims=True)
    var = jnp.mean((y - mean) ** 2, axis=(0, 2, 3), keepdims=True)
    y = (y - mean) * lax.rsqrt(var + eps)
    y = y * gamma[None, :, None, None] + beta[None, :, None, None]
    return jnp.maximum(y, 0.0)


if __name__ == "__main__":
    key = jax.random.PRNGKey(0)
    k_x, k_w, k_b, k_g, k_bb = jax.random.split(key, 5)

    N, ch_in, ch_out, H, W = 2, 4, 8, 16, 16

    x = jax.random.normal(k_x, (N, ch_in, H, W), dtype=jnp.float32)

    fan_in = ch_in * 3 * 3
    bound = 1.0 / (fan_in ** 0.5)
    w = jax.random.uniform(k_w, (ch_out, ch_in, 3, 3),
                           minval=-bound, maxval=bound, dtype=jnp.float32)
    b = jax.random.uniform(k_b, (ch_out,), minval=-bound, maxval=bound,
                           dtype=jnp.float32)
    gamma = 1.0 + 0.1 * jax.random.normal(k_g, (ch_out,), dtype=jnp.float32)
    beta = 0.1 * jax.random.normal(k_bb, (ch_out,), dtype=jnp.float32)

    # row_tile=8 exercises the multi-tile halo path (grid = (N, 2)).
    fwd = jax.jit(functools.partial(up_conv_forward, row_tile=8))
    out = fwd(x, w, b, gamma, beta)
    jax.block_until_ready(out)

    assert out.shape == (N, ch_out, 2 * H, 2 * W)

    ref = _reference_up_conv(x, w, b, gamma, beta)
    abs_err = jnp.abs(out - ref)
    max_err = float(jnp.max(abs_err))
    mean_err = float(jnp.mean(abs_err))
    assert max_err < 0.25 and mean_err < 0.02, (max_err, mean_err)

    print("KERNEL_OK")
</pallas_src>

<mosaic_0001>
module attributes {stable_mosaic.version = 11 : i64} {
  func.func @_up_conv_kernel(%arg0: i32, %arg1: i32, %arg2: memref<1x8x18x4xbf16, #tpu.memory_space<vmem>>, %arg3: memref<1x2x18x4xbf16, #tpu.memory_space<vmem>>, %arg4: memref<4x16x8xbf16, #tpu.memory_space<vmem>>, %arg5: memref<1x32xf32, #tpu.memory_space<vmem>>, %arg6: memref<1x128x32xbf16, #tpu.memory_space<vmem>>, %arg7: memref<1x1x1x32xf32, #tpu.memory_space<vmem>>, %arg8: memref<1x1x1x32xf32, #tpu.memory_space<vmem>>) attributes {dimension_semantics = [#tpu.dimension_semantics<parallel>, #tpu.dimension_semantics<parallel>], iteration_bounds = array<i64: 2, 2>, scalar_prefetch = 0 : i64, scratch_operands = 0 : i64, tpu.core_type = #tpu.core_type<tc>, window_params = [{transform_indices = @transform_0, window_bounds = array<i64: 1, 8, 18, 4>}, {transform_indices = @transform_1, window_bounds = array<i64: 1, 2, 18, 4>}, {pipeline_mode = #tpu.pipeline_mode<synchronous>, transform_indices = @transform_2, window_bounds = array<i64: 4, 16, 8>}, {pipeline_mode = #tpu.pipeline_mode<synchronous>, transform_indices = @transform_3, window_bounds = array<i64: 1, 32>}, {transform_indices = @transform_4, window_bounds = array<i64: 1, 128, 32>}, {transform_indices = @transform_5, window_bounds = array<i64: 1, 1, 1, 32>}, {transform_indices = @transform_6, window_bounds = array<i64: 1, 1, 1, 32>}]} {
    %c0 = arith.constant 0 : index
    %c0_0 = arith.constant 0 : index
    %c0_1 = arith.constant 0 : index
    %c0_2 = arith.constant 0 : index
    %0 = vector.load %arg2[%c0, %c0_0, %c0_1, %c0_2] : memref<1x8x18x4xbf16, #tpu.memory_space<vmem>>, vector<1x8x18x4xbf16>
    %1 = vector.shape_cast %0 : vector<1x8x18x4xbf16> to vector<8x18x4xbf16>
    %c0_3 = arith.constant 0 : index
    %c0_4 = arith.constant 0 : index
    %c0_5 = arith.constant 0 : index
    %c0_6 = arith.constant 0 : index
    %2 = vector.load %arg3[%c0_3, %c0_4, %c0_5, %c0_6] : memref<1x2x18x4xbf16, #tpu.memory_space<vmem>>, vector<1x2x18x4xbf16>
    %3 = vector.shape_cast %2 : vector<1x2x18x4xbf16> to vector<2x18x4xbf16>
    %4 = tpu.concatenate %1, %3 in 0 : vector<8x18x4xbf16>, vector<2x18x4xbf16> -> vector<10x18x4xbf16>
    %5 = vector.extract_strided_slice %4 {offsets = [0, 0, 0], sizes = [8, 16, 4], strides = [1, 1, 1]} : vector<10x18x4xbf16> to vector<8x16x4xbf16>
    %6 = vector.extract_strided_slice %4 {offsets = [0, 1, 0], sizes = [8, 16, 4], strides = [1, 1, 1]} : vector<10x18x4xbf16> to vector<8x16x4xbf16>
    %7 = vector.extract_strided_slice %4 {offsets = [1, 0, 0], sizes = [8, 16, 4], strides = [1, 1, 1]} : vector<10x18x4xbf16> to vector<8x16x4xbf16>
    %8 = vector.extract_strided_slice %4 {offsets = [1, 1, 0], sizes = [8, 16, 4], strides = [1, 1, 1]} : vector<10x18x4xbf16> to vector<8x16x4xbf16>
    %9 = tpu.concatenate %5, %6, %7, %8 in 2 : vector<8x16x4xbf16>, vector<8x16x4xbf16>, vector<8x16x4xbf16>, vector<8x16x4xbf16> -> vector<8x16x16xbf16>
    %10 = vector.shape_cast %9 : vector<8x16x16xbf16> to vector<128x16xbf16>
    %c0_7 = arith.constant 0 : index
    %c0_8 = arith.constant 0 : index
    %c0_9 = arith.constant 0 : index
    %11 = vector.load %arg4[%c0_7, %c0_8, %c0_9] : memref<4x16x8xbf16, #tpu.memory_space<vmem>>, vector<1x16x8xbf16>
    %12 = vector.shape_cast %11 : vector<1x16x8xbf16> to vector<16x8xbf16>
    %cst = arith.constant dense<0.000000e+00> : vector<128x8xf32>
    %13 = tpu.matmul %10, %12, %cst {dimension_numbers = #tpu.dot_dimension_numbers<[1], [0], [0], [1], [0, 0, 1, 1], [], []>} : vector<128x16xbf16>, vector<16x8xbf16>, vector<128x8xf32> -> vector<128x8xf32>
    %14 = vector.extract_strided_slice %4 {offsets = [0, 1, 0], sizes = [8, 16, 4], strides = [1, 1, 1]} : vector<10x18x4xbf16> to vector<8x16x4xbf16>
    %15 = vector.extract_strided_slice %4 {offsets = [0, 2, 0], sizes = [8, 16, 4], strides = [1, 1, 1]} : vector<10x18x4xbf16> to vector<8x16x4xbf16>
    %16 = vector.extract_strided_slice %4 {offsets = [1, 1, 0], sizes = [8, 16, 4], strides = [1, 1, 1]} : vector<10x18x4xbf16> to vector<8x16x4xbf16>
    %17 = vector.extract_strided_slice %4 {offsets = [1, 2, 0], sizes = [8, 16, 4], strides = [1, 1, 1]} : vector<10x18x4xbf16> to vector<8x16x4xbf16>
    %18 = tpu.concatenate %14, %15, %16, %17 in 2 : vector<8x16x4xbf16>, vector<8x16x4xbf16>, vector<8x16x4xbf16>, vector<8x16x4xbf16> -> vector<8x16x16xbf16>
    %19 = vector.shape_cast %18 : vector<8x16x16xbf16> to vector<128x16xbf16>
    %c1 = arith.constant 1 : index
    %c0_10 = arith.constant 0 : index
    %c0_11 = arith.constant 0 : index
    %20 = vector.load %arg4[%c1, %c0_10, %c0_11] : memref<4x16x8xbf16, #tpu.memory_space<vmem>>, vector<1x16x8xbf16>
    %21 = vector.shape_cast %20 : vector<1x16x8xbf16> to vector<16x8xbf16>
    %cst_12 = arith.constant dense<0.000000e+00> : vector<128x8xf32>
    %22 = tpu.matmul %19, %21, %cst_12 {dimension_numbers = #tpu.dot_dimension_numbers<[1], [0], [0], [1], [0, 0, 1, 1], [], []>} : vector<128x16xbf16>, vector<16x8xbf16>, vector<128x8xf32> -> vector<128x8xf32>
    %23 = vector.extract_strided_slice %4 {offsets = [1, 0, 0], sizes = [8, 16, 4], strides = [1, 1, 1]} : vector<10x18x4xbf16> to vector<8x16x4xbf16>
    %24 = vector.extract_strided_slice %4 {offsets = [1, 1, 0], sizes = [8, 16, 4], strides = [1, 1, 1]} : vector<10x18x4xbf16> to vector<8x16x4xbf16>
    %25 = vector.extract_strided_slice %4 {offsets = [2, 0, 0], sizes = [8, 16, 4], strides = [1, 1, 1]} : vector<10x18x4xbf16> to vector<8x16x4xbf16>
    %26 = vector.extract_strided_slice %4 {offsets = [2, 1, 0], sizes = [8, 16, 4], strides = [1, 1, 1]} : vector<10x18x4xbf16> to vector<8x16x4xbf16>
    %27 = tpu.concatenate %23, %24, %25, %26 in 2 : vector<8x16x4xbf16>, vector<8x16x4xbf16>, vector<8x16x4xbf16>, vector<8x16x4xbf16> -> vector<8x16x16xbf16>
    %28 = vector.shape_cast %27 : vector<8x16x16xbf16> to vector<128x16xbf16>
    %c2 = arith.constant 2 : index
    %c0_13 = arith.constant 0 : index
    %c0_14 = arith.constant 0 : index
    %29 = vector.load %arg4[%c2, %c0_13, %c0_14] : memref<4x16x8xbf16, #tpu.memory_space<vmem>>, vector<1x16x8xbf16>
    %30 = vector.shape_cast %29 : vector<1x16x8xbf16> to vector<16x8xbf16>
    %cst_15 = arith.constant dense<0.000000e+00> : vector<128x8xf32>
    %31 = tpu.matmul %28, %30, %cst_15 {dimension_numbers = #tpu.dot_dimension_numbers<[1], [0], [0], [1], [0, 0, 1, 1], [], []>} : vector<128x16xbf16>, vector<16x8xbf16>, vector<128x8xf32> -> vector<128x8xf32>
    %32 = vector.extract_strided_slice %4 {offsets = [1, 1, 0], sizes = [8, 16, 4], strides = [1, 1, 1]} : vector<10x18x4xbf16> to vector<8x16x4xbf16>
    %33 = vector.extract_strided_slice %4 {offsets = [1, 2, 0], sizes = [8, 16, 4], strides = [1, 1, 1]} : vector<10x18x4xbf16> to vector<8x16x4xbf16>
    %34 = vector.extract_strided_slice %4 {offsets = [2, 1, 0], sizes = [8, 16, 4], strides = [1, 1, 1]} : vector<10x18x4xbf16> to vector<8x16x4xbf16>
    %35 = vector.extract_strided_slice %4 {offsets = [2, 2, 0], sizes = [8, 16, 4], strides = [1, 1, 1]} : vector<10x18x4xbf16> to vector<8x16x4xbf16>
    %36 = tpu.concatenate %32, %33, %34, %35 in 2 : vector<8x16x4xbf16>, vector<8x16x4xbf16>, vector<8x16x4xbf16>, vector<8x16x4xbf16> -> vector<8x16x16xbf16>
    %37 = vector.shape_cast %36 : vector<8x16x16xbf16> to vector<128x16xbf16>
    %c3 = arith.constant 3 : index
    %c0_16 = arith.constant 0 : index
    %c0_17 = arith.constant 0 : index
    %38 = vector.load %arg4[%c3, %c0_16, %c0_17] : memref<4x16x8xbf16, #tpu.memory_space<vmem>>, vector<1x16x8xbf16>
    %39 = vector.shape_cast %38 : vector<1x16x8xbf16> to vector<16x8xbf16>
    %cst_18 = arith.constant dense<0.000000e+00> : vector<128x8xf32>
    %40 = tpu.matmul %37, %39, %cst_18 {dimension_numbers = #tpu.dot_dimension_numbers<[1], [0], [0], [1], [0, 0, 1, 1], [], []>} : vector<128x16xbf16>, vector<16x8xbf16>, vector<128x8xf32> -> vector<128x8xf32>
    %41 = tpu.concatenate %13, %22, %31, %40 in 1 : vector<128x8xf32>, vector<128x8xf32>, vector<128x8xf32>, vector<128x8xf32> -> vector<128x32xf32>
    %c0_19 = arith.constant 0 : index
    %c0_20 = arith.constant 0 : index
    %42 = vector.load %arg5[%c0_19, %c0_20] : memref<1x32xf32, #tpu.memory_space<vmem>>, vector<1x32xf32>
    %43 = vector.broadcast %42 : vector<1x32xf32> to vector<128x32xf32>
    %44 = arith.addf %41, %43 : vector<128x32xf32>
    %45 = arith.truncf %44 : vector<128x32xf32> to vector<128x32xbf16>
    %c0_21 = arith.constant 0 : index
    %c0_22 = arith.constant 0 : index
    %c0_23 = arith.constant 0 : index
    %46 = vector.load %arg6[%c0_21, %c0_22, %c0_23] : memref<1x128x32xbf16, #tpu.memory_space<vmem>>, vector<1x128x32xbf16>
    %47 = vector.shape_cast %46 : vector<1x128x32xbf16> to vector<128x32xbf16>
    %48 = vector.shape_cast %45 : vector<128x32xbf16> to vector<1x128x32xbf16>
    tpu.vector_store %arg6[%c0_21, %c0_22, %c0_23], %48 {strides = array<i32>} : memref<1x128x32xbf16, #tpu.memory_space<vmem>>, vector<1x128x32xbf16>,
    %cst_24 = arith.constant dense<0.000000e+00> : vector<32xf32>
    %49 = vector.multi_reduction <add>, %44, %cst_24 [0] : vector<128x32xf32> to vector<32xf32>
    %50 = vector.shape_cast %49 : vector<32xf32> to vector<1x32xf32>
    %c0_25 = arith.constant 0 : index
    %c0_26 = arith.constant 0 : index
    %c0_27 = arith.constant 0 : index
    %c0_28 = arith.constant 0 : index
    %51 = vector.load %arg7[%c0_25, %c0_26, %c0_27, %c0_28] : memref<1x1x1x32xf32, #tpu.memory_space<vmem>>, vector<1x1x1x32xf32>
    %52 = vector.shape_cast %51 : vector<1x1x1x32xf32> to vector<1x32xf32>
    %53 = vector.shape_cast %50 : vector<1x32xf32> to vector<1x1x1x32xf32>
    tpu.vector_store %arg7[%c0_25, %c0_26, %c0_27, %c0_28], %53 {strides = array<i32>} : memref<1x1x1x32xf32, #tpu.memory_space<vmem>>, vector<1x1x1x32xf32>,
    %54 = arith.mulf %44, %44 : vector<128x32xf32>
    %cst_29 = arith.constant dense<0.000000e+00> : vector<32xf32>
    %55 = vector.multi_reduction <add>, %54, %cst_29 [0] : vector<128x32xf32> to vector<32xf32>
    %56 = vector.shape_cast %55 : vector<32xf32> to vector<1x32xf32>
    %c0_30 = arith.constant 0 : index
    %c0_31 = arith.constant 0 : index
    %c0_32 = arith.constant 0 : index
    %c0_33 = arith.constant 0 : index
    %57 = vector.load %arg8[%c0_30, %c0_31, %c0_32, %c0_33] : memref<1x1x1x32xf32, #tpu.memory_space<vmem>>, vector<1x1x1x32xf32>
    %58 = vector.shape_cast %57 : vector<1x1x1x32xf32> to vector<1x32xf32>
    %59 = vector.shape_cast %56 : vector<1x32xf32> to vector<1x1x1x32xf32>
    tpu.vector_store %arg8[%c0_30, %c0_31, %c0_32, %c0_33], %59 {strides = array<i32>} : memref<1x1x1x32xf32, #tpu.memory_space<vmem>>, vector<1x1x1x32xf32>,
    return
  }
  func.func @transform_0(%arg0: i32, %arg1: i32) -> (i32, i32, i32, i32) {
    %c0_i32 = arith.constant 0 : i32
    %c0_i32_0 = arith.constant 0 : i32
    %c0_i32_1 = arith.constant 0 : i32
    return %arg0, %arg1, %c0_i32, %c0_i32_0 : i32, i32, i32, i32
  }
  func.func @transform_1(%arg0: i32, %arg1: i32) -> (i32, i32, i32, i32) {
    %c1_i32 = arith.constant 1 : i32
    %0 = arith.addi %arg1, %c1_i32 : i32
    %c4_i32 = arith.constant 4 : i32
    %1 = arith.muli %0, %c4_i32 : i32
    %c0_i32 = arith.constant 0 : i32
    %c0_i32_0 = arith.constant 0 : i32
    %c0_i32_1 = arith.constant 0 : i32
    return %arg0, %1, %c0_i32, %c0_i32_0 : i32, i32, i32, i32
  }
  func.func @transform_2(%arg0: i32, %arg1: i32) -> (i32, i32, i32) {
    %c0_i32 = arith.constant 0 : i32
    %c0_i32_0 = arith.constant 0 : i32
    %c0_i32_1 = arith.constant 0 : i32
    %c0_i32_2 = arith.constant 0 : i32
    return %c0_i32, %c0_i32_0, %c0_i32_1 : i32, i32, i32
  }
  func.func @transform_3(%arg0: i32, %arg1: i32) -> (i32, i32) {
    %c0_i32 = arith.constant 0 : i32
    %c0_i32_0 = arith.constant 0 : i32
    %c0_i32_1 = arith.constant 0 : i32
    return %c0_i32, %c0_i32_0 : i32, i32
  }
  func.func @transform_4(%arg0: i32, %arg1: i32) -> (i32, i32, i32) {
    %c0_i32 = arith.constant 0 : i32
    %c0_i32_0 = arith.constant 0 : i32
    return %arg0, %arg1, %c0_i32 : i32, i32, i32
  }
  func.func @transform_5(%arg0: i32, %arg1: i32) -> (i32, i32, i32, i32) {
    %c0_i32 = arith.constant 0 : i32
    %c0_i32_0 = arith.constant 0 : i32
    %c0_i32_1 = arith.constant 0 : i32
    return %arg0, %arg1, %c0_i32, %c0_i32_0 : i32, i32, i32, i32
  }
  func.func @transform_6(%arg0: i32, %arg1: i32) -> (i32, i32, i32, i32) {
    %c0_i32 = arith.constant 0 : i32
    %c0_i32_0 = arith.constant 0 : i32
    %c0_i32_1 = arith.constant 0 : i32
    return %arg0, %arg1, %c0_i32, %c0_i32_0 : i32, i32, i32, i32
  }
}

module attributes {stable_mosaic.version = 11 : i64} {
  func.func @_bn_relu_kernel(%arg0: i32, %arg1: i32, %arg2: memref<1x256x32xbf16, #tpu.memory_space<vmem>>, %arg3: memref<1x32xf32, #tpu.memory_space<vmem>>, %arg4: memref<1x32xf32, #tpu.memory_space<vmem>>, %arg5: memref<1x256x32xf32, #tpu.memory_space<vmem>>) attributes {dimension_semantics = [#tpu.dimension_semantics<parallel>, #tpu.dimension_semantics<parallel>], iteration_bounds = array<i64: 2, 1>, scalar_prefetch = 0 : i64, scratch_operands = 0 : i64, tpu.core_type = #tpu.core_type<tc>, window_params = [{transform_indices = @transform_0, window_bounds = array<i64: 1, 256, 32>}, {pipeline_mode = #tpu.pipeline_mode<synchronous>, transform_indices = @transform_1, window_bounds = array<i64: 1, 32>}, {pipeline_mode = #tpu.pipeline_mode<synchronous>, transform_indices = @transform_2, window_bounds = array<i64: 1, 32>}, {transform_indices = @transform_3, window_bounds = array<i64: 1, 256, 32>}]} {
    %c0 = arith.constant 0 : index
    %c0_0 = arith.constant 0 : index
    %c0_1 = arith.constant 0 : index
    %0 = vector.load %arg2[%c0, %c0_0, %c0_1] : memref<1x256x32xbf16, #tpu.memory_space<vmem>>, vector<1x256x32xbf16>
    %1 = arith.extf %0 : vector<1x256x32xbf16> to vector<1x256x32xf32>
    %c0_2 = arith.constant 0 : index
    %c0_3 = arith.constant 0 : index
    %2 = vector.load %arg3[%c0_2, %c0_3] : memref<1x32xf32, #tpu.memory_space<vmem>>, vector<1x32xf32>
    %3 = vector.shape_cast %2 : vector<1x32xf32> to vector<1x1x32xf32>
    %4 = vector.broadcast %3 : vector<1x1x32xf32> to vector<1x256x32xf32>
    %5 = arith.mulf %1, %4 : vector<1x256x32xf32>
    %c0_4 = arith.constant 0 : index
    %c0_5 = arith.constant 0 : index
    %6 = vector.load %arg4[%c0_4, %c0_5] : memref<1x32xf32, #tpu.memory_space<vmem>>, vector<1x32xf32>
    %7 = vector.shape_cast %6 : vector<1x32xf32> to vector<1x1x32xf32>
    %8 = vector.broadcast %7 : vector<1x1x32xf32> to vector<1x256x32xf32>
    %9 = arith.addf %5, %8 : vector<1x256x32xf32>
    %cst = arith.constant 0.000000e+00 : f32
    %10 = vector.broadcast %cst : f32 to vector<1x256x32xf32>
    %11 = arith.maximumf %9, %10 : vector<1x256x32xf32>
    %c0_6 = arith.constant 0 : index
    %c0_7 = arith.constant 0 : index
    %c0_8 = arith.constant 0 : index
    %12 = vector.load %arg5[%c0_6, %c0_7, %c0_8] : memref<1x256x32xf32, #tpu.memory_space<vmem>>, vector<1x256x32xf32>
    tpu.vector_store %arg5[%c0_6, %c0_7, %c0_8], %11 {strides = array<i32>} : memref<1x256x32xf32, #tpu.memory_space<vmem>>, vector<1x256x32xf32>,
    return
  }
  func.func @transform_0(%arg0: i32, %arg1: i32) -> (i32, i32, i32) {
    %c0_i32 = arith.constant 0 : i32
    %c0_i32_0 = arith.constant 0 : i32
    return %arg0, %arg1, %c0_i32 : i32, i32, i32
  }
  func.func @transform_1(%arg0: i32, %arg1: i32) -> (i32, i32) {
    %c0_i32 = arith.constant 0 : i32
    %c0_i32_0 = arith.constant 0 : i32
    %c0_i32_1 = arith.constant 0 : i32
    return %c0_i32, %c0_i32_0 : i32, i32
  }
  func.func @transform_2(%arg0: i32, %arg1: i32) -> (i32, i32) {
    %c0_i32 = arith.constant 0 : i32
    %c0_i32_0 = arith.constant 0 : i32
    %c0_i32_1 = arith.constant 0 : i32
    return %c0_i32, %c0_i32_0 : i32, i32
  }
  func.func @transform_3(%arg0: i32, %arg1: i32) -> (i32, i32, i32) {
    %c0_i32 = arith.constant 0 : i32
    %c0_i32_0 = arith.constant 0 : i32
    return %arg0, %arg1, %c0_i32 : i32, i32, i32
  }
}

</mosaic_0001>

<bundles_post_ra>
// kernel: tile.18
= control target key start
LH: loop header
LB: loop body
LE: loop exit
PB: predicated region body
PF: predicated region fallthrough
CT: control target
= control target key end

     0   :  { %s22_s0 = inlined_call_operand.vmem [shape: f32[8], index: 0, kind: input, shape index: {}]   ;;  %s23_s1 = inlined_call_operand.vmem [shape: f32[4,8], index: 1, kind: output, shape index: {}]  }
   0x1   :  { %v4_v0 = vld [vmem:[%s22_s0] ss:$0 sm:$0xff] }
   0x2   :  { %5 = vst [vmem:[%s23_s1] sm:$0xf] %v4_v0 }

// kernel: tile.19
= control target key start
LH: loop header
LB: loop body
LE: loop exit
PB: predicated region body
PF: predicated region fallthrough
CT: control target
= control target key end

     0   :  { %vm7_vm0 = vcmask 64512   ;;  %s37_s8 = smov 8   ;;  %s38_s9 = smov 16   ;;  %vm13_vm1 = vcmask 261312   ;;  %vm19_vm2 = vcmask 195712   ;;  %vm25_vm3 = vcmask 130112   ;;  %s55_s0 = inlined_call_operand.vmem [shape: f32[4,8], index: 0, kind: input, shape index: {}]   ;;  %s56_s1 = inlined_call_operand.vmem [shape: f32[1,32], index: 1, kind: output, shape index: {}]  }
   0x1   :  { %v4_v0 = vld [vmem:[%s55_s0] sm:$0xf]  ;;  %s36_s0 = smov 24  }
   0x2   :  { %5 = vst [vmem:[#allocation1] sm:$0xf] %v4_v0 }
   0x9   :  { %v10_v1 = vld [vmem:[#allocation1 + $0x3] sm:$0x1]   ;;  %v22_v2 = vld [vmem:[#allocation1 + $0x1] sm:$0x1]   ;;  %v6_v3 = vld [vmem:[#allocation1] sm:$0x1]  }
   0xa   :  { %11 = vrot.lane.b32.xlu0 %v10_v1, %s36_s0  ;;  %23 = vrot.lane.b32.xlu1 %v22_v2, %s37_s8  ;;  %v16_v4 = vld [vmem:[#allocation1 + $0x2] sm:$0x1]   ;;  %8 = vst.msk [vmem:[#allocation0] sm:$0x1] %vm7_vm0, %v6_v3  }
   0xe   :  { %17 = vrot.lane.b32.xlu0 %v16_v4, %s38_s9 }
  0x7c   :  { %v12_v5 = vpop.permute.xlu0 %11   ;;  %v24_v6 = vpop.permute.xlu1 %23  }
  0x7d   :  { %14 = vst.msk [vmem:[#allocation0] sm:$0x1] %vm13_vm1, %v12_v5  }
  0x80   :  { %v18_v7 = vpop.permute.xlu0 %17  }
  0x81   :  { %20 = vst.msk [vmem:[#allocation0] sm:$0x1] %vm19_vm2, %v18_v7  }
  0x82   :  { %26 = vst.msk [vmem:[#allocation0] sm:$0x1] %vm25_vm3, %v24_v6  }
  0x89   :  { %v30_v8 = vld [vmem:[#allocation0] sm:$0x1] }
  0x8a   :  { %32 = vst [vmem:[%s56_s1] sm:$0x1] %v30_v8 }

// kernel: up_conv_forward.3
= control target key start
LH: loop header
LB: loop body
LE: loop exit
PB: predicated region body
PF: predicated region fallthrough
CT: control target
= control target key end

     0   :  { %s666_s12 = smov 0   ;;  %s668_s13 = smov 0   ;;  %s861_s0 = inlined_call_operand.vmem [shape: bf16[2,256,32], index: 0, kind: input, shape index: {}]   ;;  %s862_s1 = inlined_call_operand.vmem [shape: f32[1,32], index: 1, kind: input, shape index: {}]   ;;  %s863_s2 = inlined_call_operand.vmem [shape: f32[1,32], index: 2, kind: input, shape index: {}]   ;;  %s864_s3 = inlined_call_operand.vmem [shape: f32[2,256,32], index: 3, kind: output, shape index: {}]  }
   0x1   :  { %s670_s14 = smov 0  }
   0x2 LB: > { %s25_s15 = sadd.s32 1, %s640_s13  ;;  %p508_p0 = scmp.ge.s32.totalorder %s644_s14, 1  ;;  %s644_s14 = sphi %s670_s14, %s13_s14   ;;  %s640_s13 = sphi %s668_s13, %s866_s13   ;;  %s636_s12 = sphi %s666_s12, %s865_s12  }
   0x3   : > { %p27_p1 = scmp.ge.s32.totalorder %s25_s15, 2  ;;  %p158_p2 = scmp.lt.s32.totalorder %s644_s14, 3 }
   0x5   : > { %s868_s15 = smov (%p27_p1, %s25_s15), 0  ;;  %p159_p3 = pnand %p508_p0, %p158_p2 }
   0x6   : > { %p191_p4 = scmp.lt.s32.totalorder (!%p159_p3), %s636_s12, 1  ;;  %v695_v0 = vld [vmem:[%s862_s1] ss:$0 sm:$0xff] (!%p159_p3)  ;;  %vm384_vm0 = vcmask (!%p159_p3), 261120  }
   0x7   : > { %162 = sbr.rel (%p159_p3) target bundleno = 54 (0x36), region = 32  ;;  %v704_v9 = vld [vmem:[%s863_s2] ss:$0 sm:$0xff] (!%p159_p3) }
   0xe   : > { %s870_s12 = smov (!%p191_p4, %s636_s12), 1 }
   0xf   : > { %s517_s16 = sshll.u32 %s870_s12, 7  ;;  %s518_s24 = sshll.u32 %s870_s12, 8 }
  0x10   : > { %s690_s19 = scalar_lea.vmem %s861_s0, %s517_s16  ;;  %s722_s27 = scalar_lea.vmem %s864_s3, %s518_s24 }
  0x11   : > { %v520_v1 = vld [vmem:[%s690_s19] sm:$0xff]   ;;  %v583_v2 = vld [vmem:[%s690_s19 + $0x8] sm:$0xff]   ;;  %v584_v3 = vld [vmem:[%s690_s19 + $0x10] sm:$0xff]  }
  0x12   : > { %v521_v4 = vunpack.c.l.bf16 %v520_v1  ;;  %v522_v5 = vunpack.c.h.bf16 %v520_v1  ;;  %v525_v6 = vunpack.c.l.bf16 %v583_v2  ;;  %v526_v7 = vunpack.c.h.bf16 %v583_v2  ;;  %v585_v8 = vld [vmem:[%s690_s19 + $0x18] sm:$0xff]   ;;  %v586_v30 = vld [vmem:[%s690_s19 + $0x20] sm:$0xff]   ;;  %v587_v31 = vld [vmem:[%s690_s19 + $0x28] sm:$0xff]  }
  0x13   : > { %v529_v10 = vunpack.c.l.bf16 %v584_v3  ;;  %v530_v11 = vunpack.c.h.bf16 %v584_v3  ;;  %v533_v12 = vunpack.c.l.bf16 %v585_v8  ;;  %v534_v13 = vunpack.c.h.bf16 %v585_v8  ;;  %v588_v36 = vld [vmem:[%s690_s19 + $0x30] sm:$0xff]   ;;  %v589_v37 = vld [vmem:[%s690_s19 + $0x38] sm:$0xff]   ;;  %v590_v3 = vld [vmem:[%s690_s19 + $0x40] sm:$0xff]  }
  0x14   : > { %v281_v14 = vmul.f32 %v521_v4, %v695_v0  ;;  %v282_v15 = vmul.f32 %v522_v5, %v695_v0  ;;  %v283_v16 = vmul.f32 %v525_v6, %v695_v0  ;;  %v284_v17 = vmul.f32 %v526_v7, %v695_v0  ;;  %v591_v4 = vld [vmem:[%s690_s19 + $0x48] sm:$0xff]  }
  0x15   : > { %v285_v18 = vmul.f32 %v529_v10, %v695_v0  ;;  %v286_v19 = vmul.f32 %v530_v11, %v695_v0  ;;  %v287_v20 = vmul.f32 %v533_v12, %v695_v0  ;;  %v288_v21 = vmul.f32 %v534_v13, %v695_v0  ;;  %v592_v10 = vld [vmem:[%s690_s19 + $0x50] sm:$0xff]   ;;  %v593_v11 = vld [vmem:[%s690_s19 + $0x58] sm:$0xff]  }
  0x16   : > { %v320_v22 = vadd.f32 %v704_v9, %v281_v14  ;;  %v321_v23 = vadd.f32 %v704_v9, %v282_v15  ;;  %v322_v24 = vadd.f32 %v704_v9, %v283_v16  ;;  %v323_v25 = vadd.f32 %v704_v9, %v284_v17 }
  0x17   : > { %v324_v26 = vadd.f32 %v704_v9, %v285_v18  ;;  %v325_v27 = vadd.f32 %v704_v9, %v286_v19  ;;  %v326_v28 = vadd.f32 %v704_v9, %v287_v20  ;;  %v327_v29 = vadd.f32 %v704_v9, %v288_v21 }
  0x18   : > { %v352_v32 = vmax.f32 %v320_v22, 0.0  ;;  %v353_v33 = vmax.f32 %v321_v23, 0.0  ;;  %v354_v34 = vmax.f32 %v322_v24, 0.0  ;;  %v355_v35 = vmax.f32 %v323_v25, 0.0 }
  0x19   : > { %v356_v38 = vmax.f32 %v324_v26, 0.0  ;;  %v357_v39 = vmax.f32 %v325_v27, 0.0  ;;  %v358_v40 = vmax.f32 %v326_v28, 0.0  ;;  %v359_v41 = vmax.f32 %v327_v29, 0.0 }
  0x1a   : > { %385 = vst.msk [vmem:[%s722_s27] sm:$0xff] %vm384_vm0, %v352_v32  ;;  %386 = vst.msk [vmem:[%s722_s27 + $0x8] sm:$0xff] %vm384_vm0, %v353_v33  ;;  %v537_v42 = vunpack.c.l.bf16 %v586_v30  ;;  %v538_v43 = vunpack.c.h.bf16 %v586_v30  ;;  %v541_v44 = vunpack.c.l.bf16 %v587_v31  ;;  %v542_v45 = vunpack.c.h.bf16 %v587_v31 }
  0x1b   : > { %387 = vst.msk [vmem:[%s722_s27 + $0x10] sm:$0xff] %vm384_vm0, %v354_v34  ;;  %388 = vst.msk [vmem:[%s722_s27 + $0x18] sm:$0xff] %vm384_vm0, %v355_v35  ;;  %v545_v46 = vunpack.c.l.bf16 %v588_v36  ;;  %v546_v47 = vunpack.c.h.bf16 %v588_v36  ;;  %v549_v48 = vunpack.c.l.bf16 %v589_v37  ;;  %v550_v49 = vunpack.c.h.bf16 %v589_v37 }
  0x1c   : > { %389 = vst.msk [vmem:[%s722_s27 + $0x20] sm:$0xff] %vm384_vm0, %v356_v38  ;;  %390 = vst.msk [vmem:[%s722_s27 + $0x28] sm:$0xff] %vm384_vm0, %v357_v39  ;;  %v289_v50 = vmul.f32 %v537_v42, %v695_v0  ;;  %v290_v51 = vmul.f32 %v538_v43, %v695_v0  ;;  %v291_v52 = vmul.f32 %v541_v44, %v695_v0  ;;  %v553_v16 = vunpack.c.l.bf16 %v590_v3 }
  0x1d   : > { %391 = vst.msk [vmem:[%s722_s27 + $0x30] sm:$0xff] %vm384_vm0, %v358_v40  ;;  %392 = vst.msk [vmem:[%s722_s27 + $0x38] sm:$0xff] %vm384_vm0, %v359_v41  ;;  %v292_v53 = vmul.f32 %v542_v45, %v695_v0  ;;  %v293_v54 = vmul.f32 %v545_v46, %v695_v0  ;;  %v294_v55 = vmul.f32 %v546_v47, %v695_v0  ;;  %v554_v17 = vunpack.c.h.bf16 %v590_v3  ;;  %v594_v40 = vld [vmem:[%s690_s19 + $0x60] sm:$0xff]   ;;  %v595_v41 = vld [vmem:[%s690_s19 + $0x68] sm:$0xff]  }
  0x1e   : > { %v295_v56 = vmul.f32 %v549_v48, %v695_v0  ;;  %v296_v57 = vmul.f32 %v550_v49, %v695_v0  ;;  %v328_v58 = vadd.f32 %v704_v9, %v289_v50  ;;  %v329_v59 = vadd.f32 %v704_v9, %v290_v51  ;;  %v596_v46 = vld [vmem:[%s690_s19 + $0x70] sm:$0xff]   ;;  %v597_v47 = vld [vmem:[%s690_s19 + $0x78] sm:$0xff]  }
  0x1f   : > { %v330_v60 = vadd.f32 %v704_v9, %v291_v52  ;;  %v331_v61 = vadd.f32 %v704_v9, %v292_v53  ;;  %v332_v62 = vadd.f32 %v704_v9, %v293_v54  ;;  %v333_v63 = vadd.f32 %v704_v9, %v294_v55 }
  0x20   : > { %v334_v1 = vadd.f32 %v704_v9, %v295_v56  ;;  %v335_v2 = vadd.f32 %v704_v9, %v296_v57  ;;  %v360_v5 = vmax.f32 %v328_v58, 0.0  ;;  %v361_v6 = vmax.f32 %v329_v59, 0.0 }
  0x21   : > { %v362_v7 = vmax.f32 %v330_v60, 0.0  ;;  %v363_v8 = vmax.f32 %v331_v61, 0.0  ;;  %v364_v12 = vmax.f32 %v332_v62, 0.0  ;;  %v365_v13 = vmax.f32 %v333_v63, 0.0 }
  0x22   : > { %v366_v14 = vmax.f32 %v334_v1, 0.0  ;;  %v367_v15 = vmax.f32 %v335_v2, 0.0  ;;  %393 = vst.msk [vmem:[%s722_s27 + $0x40] sm:$0xff] %vm384_vm0, %v360_v5  ;;  %394 = vst.msk [vmem:[%s722_s27 + $0x48] sm:$0xff] %vm384_vm0, %v361_v6  ;;  %v557_v18 = vunpack.c.l.bf16 %v591_v4  ;;  %v558_v19 = vunpack.c.h.bf16 %v591_v4 }
  0x23   : > { %395 = vst.msk [vmem:[%s722_s27 + $0x50] sm:$0xff] %vm384_vm0, %v362_v7  ;;  %396 = vst.msk [vmem:[%s722_s27 + $0x58] sm:$0xff] %vm384_vm0, %v363_v8  ;;  %v561_v20 = vunpack.c.l.bf16 %v592_v10  ;;  %v562_v21 = vunpack.c.h.bf16 %v592_v10  ;;  %v565_v22 = vunpack.c.l.bf16 %v593_v11  ;;  %v566_v23 = vunpack.c.h.bf16 %v593_v11 }
  0x24   : > { %397 = vst.msk [vmem:[%s722_s27 + $0x60] sm:$0xff] %vm384_vm0, %v364_v12  ;;  %398 = vst.msk [vmem:[%s722_s27 + $0x68] sm:$0xff] %vm384_vm0, %v365_v13  ;;  %v297_v24 = vmul.f32 %v553_v16, %v695_v0  ;;  %v298_v25 = vmul.f32 %v554_v17, %v695_v0  ;;  %v299_v26 = vmul.f32 %v557_v18, %v695_v0  ;;  %v569_v52 = vunpack.c.l.bf16 %v594_v40 }
  0x25   : > { %399 = vst.msk [vmem:[%s722_s27 + $0x70] sm:$0xff] %vm384_vm0, %v366_v14  ;;  %400 = vst.msk [vmem:[%s722_s27 + $0x78] sm:$0xff] %vm384_vm0, %v367_v15  ;;  %v300_v27 = vmul.f32 %v558_v19, %v695_v0  ;;  %v301_v28 = vmul.f32 %v561_v20, %v695_v0  ;;  %v302_v29 = vmul.f32 %v562_v21, %v695_v0  ;;  %v570_v53 = vunpack.c.h.bf16 %v594_v40 }
  0x26   : > { %v303_v30 = vmul.f32 %v565_v22, %v695_v0  ;;  %v304_v31 = vmul.f32 %v566_v23, %v695_v0  ;;  %v336_v32 = vadd.f32 %v704_v9, %v297_v24  ;;  %v337_v33 = vadd.f32 %v704_v9, %v298_v25 }
  0x27   : > { %v338_v34 = vadd.f32 %v704_v9, %v299_v26  ;;  %v339_v35 = vadd.f32 %v704_v9, %v300_v27  ;;  %v340_v36 = vadd.f32 %v704_v9, %v301_v28  ;;  %v341_v37 = vadd.f32 %v704_v9, %v302_v29 }
  0x28   : > { %v342_v38 = vadd.f32 %v704_v9, %v303_v30  ;;  %v343_v39 = vadd.f32 %v704_v9, %v304_v31  ;;  %v368_v42 = vmax.f32 %v336_v32, 0.0  ;;  %v369_v43 = vmax.f32 %v337_v33, 0.0 }
  0x29   : > { %v370_v44 = vmax.f32 %v338_v34, 0.0  ;;  %v371_v45 = vmax.f32 %v339_v35, 0.0  ;;  %v372_v48 = vmax.f32 %v340_v36, 0.0  ;;  %v373_v49 = vmax.f32 %v341_v37, 0.0 }
  0x2a   : > { %v374_v50 = vmax.f32 %v342_v38, 0.0  ;;  %v375_v51 = vmax.f32 %v343_v39, 0.0  ;;  %401 = vst.msk [vmem:[%s722_s27 + $0x80] sm:$0xff] %vm384_vm0, %v368_v42  ;;  %402 = vst.msk [vmem:[%s722_s27 + $0x88] sm:$0xff] %vm384_vm0, %v369_v43  ;;  %v573_v54 = vunpack.c.l.bf16 %v595_v41  ;;  %v574_v55 = vunpack.c.h.bf16 %v595_v41 }
  0x2b   : > { %403 = vst.msk [vmem:[%s722_s27 + $0x90] sm:$0xff] %vm384_vm0, %v370_v44  ;;  %404 = vst.msk [vmem:[%s722_s27 + $0x98] sm:$0xff] %vm384_vm0, %v371_v45  ;;  %v577_v56 = vunpack.c.l.bf16 %v596_v46  ;;  %v578_v57 = vunpack.c.h.bf16 %v596_v46  ;;  %v581_v58 = vunpack.c.l.bf16 %v597_v47  ;;  %v582_v59 = vunpack.c.h.bf16 %v597_v47 }
  0x2c   : > { %405 = vst.msk [vmem:[%s722_s27 + $0xa0] sm:$0xff] %vm384_vm0, %v372_v48  ;;  %406 = vst.msk [vmem:[%s722_s27 + $0xa8] sm:$0xff] %vm384_vm0, %v373_v49  ;;  %v305_v60 = vmul.f32 %v569_v52, %v695_v0  ;;  %v306_v61 = vmul.f32 %v570_v53, %v695_v0  ;;  %v307_v62 = vmul.f32 %v573_v54, %v695_v0 }
  0x2d   : > { %407 = vst.msk [vmem:[%s722_s27 + $0xb0] sm:$0xff] %vm384_vm0, %v374_v50  ;;  %408 = vst.msk [vmem:[%s722_s27 + $0xb8] sm:$0xff] %vm384_vm0, %v375_v51  ;;  %v308_v63 = vmul.f32 %v574_v55, %v695_v0  ;;  %v309_v1 = vmul.f32 %v577_v56, %v695_v0  ;;  %v310_v2 = vmul.f32 %v578_v57, %v695_v0 }
  0x2e   : > { %v311_v3 = vmul.f32 %v581_v58, %v695_v0  ;;  %v312_v4 = vmul.f32 %v582_v59, %v695_v0  ;;  %v344_v5 = vadd.f32 %v704_v9, %v305_v60  ;;  %v345_v6 = vadd.f32 %v704_v9, %v306_v61 }
  0x2f   : > { %v346_v7 = vadd.f32 %v704_v9, %v307_v62  ;;  %v347_v8 = vadd.f32 %v704_v9, %v308_v63  ;;  %v348_v10 = vadd.f32 %v704_v9, %v309_v1  ;;  %v349_v11 = vadd.f32 %v704_v9, %v310_v2 }
  0x30   : > { %v350_v0 = vadd.f32 %v704_v9, %v311_v3  ;;  %v351_v12 = vadd.f32 %v704_v9, %v312_v4  ;;  %v376_v13 = vmax.f32 %v344_v5, 0.0  ;;  %v377_v14 = vmax.f32 %v345_v6, 0.0 }
  0x31   : > { %v378_v15 = vmax.f32 %v346_v7, 0.0  ;;  %v379_v16 = vmax.f32 %v347_v8, 0.0  ;;  %v380_v17 = vmax.f32 %v348_v10, 0.0  ;;  %v381_v18 = vmax.f32 %v349_v11, 0.0 }
  0x32   : > { %v382_v19 = vmax.f32 %v350_v0, 0.0  ;;  %v383_v20 = vmax.f32 %v351_v12, 0.0  ;;  %409 = vst.msk [vmem:[%s722_s27 + $0xc0] sm:$0xff] %vm384_vm0, %v376_v13  ;;  %410 = vst.msk [vmem:[%s722_s27 + $0xc8] sm:$0xff] %vm384_vm0, %v377_v14 }
  0x33   : > { %411 = vst.msk [vmem:[%s722_s27 + $0xd0] sm:$0xff] %vm384_vm0, %v378_v15  ;;  %412 = vst.msk [vmem:[%s722_s27 + $0xd8] sm:$0xff] %vm384_vm0, %v379_v16 }
  0x34   : > { %413 = vst.msk [vmem:[%s722_s27 + $0xe0] sm:$0xff] %vm384_vm0, %v380_v17  ;;  %414 = vst.msk [vmem:[%s722_s27 + $0xe8] sm:$0xff] %vm384_vm0, %v381_v18 }
  0x35   : > { %415 = vst.msk [vmem:[%s722_s27 + $0xf0] sm:$0xff] %vm384_vm0, %v382_v19  ;;  %416 = vst.msk [vmem:[%s722_s27 + $0xf8] sm:$0xff] %vm384_vm0, %v383_v20 }
  0x36 PF: > { %s13_s14 = sadd.s32 1, %s644_s14   ;;  %s865_s12 = smov %s640_s13 }
  0x37   : > { %p10_p5 = scmp.ge.s32.totalorder %s13_s14, 4   ;;  %s866_s13 = smov %s868_s15 }
  0x39   :  { %12 = sbr.rel (!%p10_p5) target bundleno = 2 (0x2), region = 62 }

// kernel: up_conv_forward.2
= control target key start
LH: loop header
LB: loop body
LE: loop exit
PB: predicated region body
PF: predicated region fallthrough
CT: control target
= control target key end

     0   :  { %s2457_s21 = smov 0   ;;  %s2459_s22 = smov 0   ;;  %s3163_s0 = inlined_call_operand.vmem [shape: bf16[2,18,18,4], index: 0, kind: input, shape index: {}, may-alias: {0,1}]   ;;  %s3164_s1 = inlined_call_operand.vmem [shape: bf16[2,18,18,4], index: 1, kind: input, shape index: {}, may-alias: {0,1}]   ;;  %s3165_s2 = inlined_call_operand.vmem [shape: bf16[4,16,8], index: 2, kind: input, shape index: {}]   ;;  %s3166_s3 = inlined_call_operand.vmem [shape: f32[1,32], index: 3, kind: input, shape index: {}]   ;;  %s3167_s4 = inlined_call_operand.vmem [shape: bf16[2,256,32], index: 4, kind: output, shape index: {0}]   ;;  %s3168_s5 = inlined_call_operand.vmem [shape: f32[2,2,1,32], index: 5, kind: output, shape index: {1}]   ;;  %s3169_s6 = inlined_call_operand.vmem [shape: f32[2,2,1,32], index: 6, kind: output, shape index: {2}]  }
   0x1   :  { %s2461_s23 = smov 0   ;;  %s2463_s24 = smov 0  }
   0x2   :  { %s2465_s25 = smov 0  }
   0x3 LB: > { %s26_s26 = sadd.s32 1, %s2407_s23  ;;  %s29_s27 = sadd.s32 1, %s2411_s24  ;;  %s2415_s25 = sphi %s2465_s25, %s17_s25   ;;  %s2411_s24 = sphi %s2463_s24, %s3173_s24   ;;  %s2407_s23 = sphi %s2461_s23, %s3172_s23   ;;  %s2403_s22 = sphi %s2459_s22, %s3171_s22   ;;  %s2399_s21 = sphi %s2457_s21, %s3170_s21  }
   0x4   : > { %p27_p0 = scmp.ge.s32.totalorder %s26_s26, 2  ;;  %p2080_p1 = scmp.ge.s32.totalorder %s2415_s25, 1 }
   0x5   : > { %p279_p2 = scmp.lt.s32.totalorder %s2415_s25, 5 }
   0x6   : > { %s3175_s26 = smov (%p27_p0, %s26_s26), 0  ;;  %s3177_s27 = smov (!%p27_p0, %s29_s27), %s2411_s24 }
   0x7   : > { %p280_p3 = pnand %p2080_p1, %p279_p2  ;;  %p31_p4 = scmp.ge.s32.totalorder %s3177_s27, 2 }
   0x8   : > { %s2490_s28 = sshll.u32 (!%p280_p3), %s2399_s21, 3  ;;  %p355_p5 = scmp.lt.s32.totalorder (!%p280_p3), %s2403_s22, 1  ;;  %vm504_vm0 = vsmask.f32 (!%p280_p3), 7424  ;;  %v2371_v37 = vld [vmem:[%s3165_s2] sm:$0xff] (!%p280_p3)   ;;  %v2373_v40 = vld [vmem:[%s3165_s2 + $0x8] sm:$0xff] (!%p280_p3)  }
   0x9   : > { %s3179_s27 = smov (%p31_p4, %s3177_s27), 0  ;;  %283 = sbr.rel (%p280_p3) target bundleno = 659 (0x293), region = 36 }
   0xa   : > { %p357_p6 = scmp.lt.s32.totalorder (!%p280_p3), %s2490_s28, 17  ;;  %s2417_s13 = smov (!%p280_p3), 8   ;;  %2233 = vmatprep.subr.bf16.mxu0 (!%p280_p3), %v2371_v37  ;;  %2251 = vmatprep.subr.bf16.mxu1 (!%p280_p3), %v2373_v40  ;;  %vm669_vm1 = vcmask (!%p280_p3), 31744   ;;  %vm686_vm2 = vcmask (!%p280_p3), 64512   ;;  %vm703_vm3 = vcmask (!%p280_p3), 97280   ;;  %vm728_vm4 = vcmask (!%p280_p3), 130048  }
   0xb   : > { %s2418_s14 = smov (!%p280_p3), 12   ;;  %s2419_s15 = smov (!%p280_p3), 4   ;;  %2234 = vmatpush3.bf16.msra.mxu0 (!%p280_p3), %v2371_v37  ;;  %2252 = vmatpush3.bf16.msra.mxu1 (!%p280_p3), %v2373_v40  ;;  %vm1663_vm5 = vcmask (!%p280_p3), 195584   ;;  %vm1767_vm6 = vcmask (!%p280_p3), 257024   ;;  %vm1784_vm7 = vcmask (!%p280_p3), 261120   ;;  %vm1822_vm8 = vcmask (!%p280_p3), 253952  }
   0xc   : > { %s2196_s16 = sadd.s32 (!%p280_p3), 8, %s2490_s28  ;;  %p397_p9 = scmp.lt.s32.totalorder (!%p280_p3), %s2399_s21, 1 }
   0xd   : > { %p375_p7 = scmp.lt.s32.totalorder (!%p280_p3), %s2196_s16, 17 }
  0x10   : > { %s3181_s22 = smov (!%p355_p5, %s2403_s22), 1  ;;  %s3183_s16 = smov (!%p375_p7, %s2196_s16), 17 }
  0x11   : > { %s358_s29 = scalar_select %p357_p6, %s2490_s28, 17 }
  0x12   : > { %s2306_s30 = smul.u32 54, %s3181_s22  ;;  %s2087_s17 = sshll.u32 %s3181_s22, 5 }
  0x13   : > { %s2305_s7 = smul.u32 3, %s358_s29 }
  0x14   : > { %s2307_s19 = smul.u32 3, %s3183_s16 }
  0x15   : > { %s361_s8 = sadd.s32 %s2306_s30, %s2305_s7 }
  0x16   : > { %s2082_s9 = sshll.u32 %s361_s8, 2  ;;  %s379_s29 = sadd.s32 %s2307_s19, %s2306_s30 }
  0x17   : > { %s2502_s12 = scalar_lea.vmem %s3163_s0, %s2082_s9  ;;  %s2085_s7 = sshll.u32 %s379_s29, 2 }
  0x18   : > { %v2505_v0 = vld [vmem:[%s2502_s12 + $0x14] ss:$0 sps:$4 sm:$0x11]   ;;  %v2508_v1 = vld [vmem:[%s2502_s12 + $0xc] sm:$0xff]   ;;  %v2516_v3 = vld [vmem:[%s2502_s12 + $0x18] sm:$0xff]   ;;  %s2582_s10 = scalar_lea.vmem %s3164_s1, %s2085_s7  ;;  %s2089_s9 = sshll.u32 %s3181_s22, 1 }
  0x19   : > { %874 = vrot.lane.b32.xlu0 %v2505_v0, %s2417_s13  ;;  %622 = vrot.lane.b32.xlu1 %v2508_v1, %s2417_s13  ;;  %v844_v2 = vshrl.u32 %v2505_v0, 16  ;;  %v520_v4 = vshll.u32 %v2508_v1, 16  ;;  %v2520_v5 = vld [vmem:[%s2502_s12 + $0x8] ss:$0 sps:$4 sm:$0x11]   ;;  %v2523_v6 = vld [vmem:[%s2502_s12] sm:$0xff]  }
  0x1a   : > { %v518_v7 = vshrl.u32 %v2508_v1, 16  ;;  %v525_v8 = vshll.u32 %v2505_v0, 16  ;;  %v506_v9 = vshrl.u32 %v2523_v6, 16  ;;  %v508_v10 = vshll.u32 %v2523_v6, 16  ;;  %v2535_v17 = vld [vmem:[%s2502_s12 + $0x24] sm:$0xff]   ;;  %v2565_v39 = vld [vmem:[%s2502_s12 + $0x30] sm:$0xff]  }
  0x1b   : > { %v513_v11 = vshll.u32 %v2520_v5, 16  ;;  %v522_v12 = vrot.slane %v520_v4, 1  ;;  %v842_v13 = vshrl.u32 %v2520_v5, 16  ;;  %v2538_v20 = vld [vmem:[%s2502_s12 + $0x20] ss:$0 sps:$4 sm:$0x11]  }
  0x1c   : > { %v510_v14 = vrot.slane %v508_v10, 1  ;;  %v527_v16 = vrot.slane %v525_v8, 1  ;;  %v532_v21 = vshll.u32 %v2516_v3, 16  ;;  %v2544_v23 = vld [vmem:[%s2502_s12 + $0x2c] ss:$0 sps:$4 sm:$0x11]  }
  0x1d   : > { %892 = vrot.lane.b32.xlu0 %v844_v2, %s2418_s14  ;;  %624 = vrot.lane.b32.xlu1 %v2516_v3, %s2417_s13  ;;  %v515_v15 = vrot.slane %v513_v11, 1  ;;  %v523_v19 = vor.u32 %v522_v12, %v518_v7  ;;  %v544_v24 = vshll.u32 %v2535_v17, 16  ;;  %v530_v25 = vshrl.u32 %v2516_v3, 16  ;;  %v2576_v42 = vld [vmem:[%s2502_s12 + $0x38] ss:$0 sps:$4 sm:$0x11]  }
  0x1e   : > { %v511_v18 = vor.u32 %v510_v14, %v506_v9  ;;  %v534_v27 = vrot.slane %v532_v21, 1  ;;  %v537_v28 = vshll.u32 %v2538_v20, 16  ;;  %v542_v29 = vshrl.u32 %v2535_v17, 16  ;;  %v2591_v47 = vld [vmem:[%s2502_s12 + $0x3c] sm:$0xff]   ;;  %v2613_v60 = vld [vmem:[%s2502_s12 + $0x48] sm:$0xff]   ;;  %v2629_v8 = vld [vmem:[%s2502_s12 + $0x54] sm:$0xff]  }
  0x1f   : > { %v528_v26 = vsel %vm504_vm0, %v523_v19, %v527_v16  ;;  %v546_v30 = vrot.slane %v544_v24, 1  ;;  %v549_v31 = vshll.u32 %v2544_v23, 16  ;;  %v846_v32 = vshrl.u32 %v2538_v20, 16  ;;  %v2598_v51 = vld [vmem:[%s2502_s12 + $0x44] ss:$0 sps:$4 sm:$0x11]  }
  0x20   : > { %v516_v22 = vsel %vm504_vm0, %v511_v18, %v515_v15  ;;  %v535_v33 = vor.u32 %v534_v27, %v530_v25  ;;  %v539_v34 = vrot.slane %v537_v28, 1  ;;  %v556_v43 = vshll.u32 %v2565_v39, 16  ;;  %v2619_v62 = vld [vmem:[%s2502_s12 + $0x50] ss:$0 sps:$4 sm:$0x11]   ;;  %v2657_v25 = vld [vmem:[%s2582_s10] sm:$0xff]  }
  0x21   : > { %858 = vrot.lane.b32.xlu1 %v842_v13, %s2419_s15  ;;  %601 = vrot.lane.b32.xlu0 %v516_v22, %s2419_s15  ;;  %v547_v35 = vor.u32 %v546_v30, %v542_v29  ;;  %v551_v36 = vrot.slane %v549_v31, 1  ;;  %v554_v44 = vshrl.u32 %v2565_v39, 16  ;;  %v561_v46 = vshll.u32 %v2576_v42, 16  ;;  %v2636_v12 = vld [vmem:[%s2502_s12 + $0x5c] ss:$0 sps:$4 sm:$0x11]  }
  0x22   : > { %v540_v38 = vsel %vm504_vm0, %v535_v33, %v539_v34  ;;  %v558_v45 = vrot.slane %v556_v43, 1  ;;  %v848_v50 = vshrl.u32 %v2544_v23, 16  ;;  %v568_v52 = vshll.u32 %v2591_v47, 16  ;;  %v2645_v15 = vld [vmem:[%s3165_s2 + $0x10] sm:$0xff]   ;;  %v2671_v29 = vld [vmem:[%s3165_s2 + $0x18] sm:$0xff]  }
  0x23   : > { %v552_v41 = vsel %vm504_vm0, %v547_v35, %v551_v36  ;;  %v563_v49 = vrot.slane %v561_v46, 1  ;;  %v566_v54 = vshrl.u32 %v2591_v47, 16  ;;  %v573_v56 = vshll.u32 %v2598_v51, 16  ;;  %2269 = vmatprep.subr.bf16.mxu0 %v2645_v15  ;;  %v2663_v27 = vld [vmem:[%s2582_s10 + $0x8] ss:$0 sps:$4 sm:$0x11]   ;;  %2287 = vmatprep.subr.bf16.mxu1 %v2671_v29 }
  0x24   : > { %v559_v48 = vor.u32 %v558_v45, %v554_v44  ;;  %v570_v55 = vrot.slane %v568_v52, 1  ;;  %v850_v57 = vshrl.u32 %v2576_v42, 16  ;;  %v580_v63 = vshll.u32 %v2613_v60, 16  ;;  %v2372_v37 = vld [vmem:[%s2582_s10 + $0xc] sm:$0xff]  }
  0x25   : > { %860 = vrot.lane.b32.xlu1 %v844_v2, %s2419_s15  ;;  %603 = vrot.lane.b32.xlu0 %v528_v26, %s2419_s15  ;;  %v575_v59 = vrot.slane %v573_v56, 1  ;;  %v578_v2 = vshrl.u32 %v2613_v60, 16  ;;  %v585_v7 = vshll.u32 %v2619_v62, 16  ;;  %v852_v11 = vshrl.u32 %v2598_v51, 16 }
  0x26   : > { %v564_v53 = vsel %vm504_vm0, %v559_v48, %v563_v49  ;;  %v571_v58 = vor.u32 %v570_v55, %v566_v54  ;;  %v582_v4 = vrot.slane %v580_v63, 1  ;;  %v592_v13 = vshll.u32 %v2629_v8, 16  ;;  %v2374_v40 = vld [vmem:[%s2582_s10 + $0x14] ss:$0 sps:$4 sm:$0x11]  }
  0x27   : > { %v587_v10 = vrot.slane %v585_v7, 1  ;;  %v590_v16 = vshrl.u32 %v2629_v8, 16  ;;  %v597_v19 = vshll.u32 %v2636_v12, 16  ;;  %v854_v21 = vshrl.u32 %v2619_v62, 16 }
  0x28   : > { %v576_v61 = vsel %vm504_vm0, %v571_v58, %v575_v59  ;;  %v583_v9 = vor.u32 %v582_v4, %v578_v2  ;;  %v594_v18 = vrot.slane %v592_v13, 1  ;;  %v644_v28 = vshll.u32 %v2657_v25, 16 }
  0x29   : > { %876 = vrot.lane.b32.xlu1 %v2538_v20, %s2417_s13  ;;  %653 = vrot.lane.b32.xlu0 %v528_v26, %s2418_s14  ;;  %v599_v24 = vrot.slane %v597_v19, 1  ;;  %v642_v30 = vshrl.u32 %v2657_v25, 16  ;;  %v856_v35 = vshrl.u32 %v2636_v12, 16  ;;  %v1179_v43 = vshrl.u32 %v2372_v37, 16 }
  0x2a   : > { %v588_v14 = vsel %vm504_vm0, %v583_v9, %v587_v10  ;;  %v595_v22 = vor.u32 %v594_v18, %v590_v16  ;;  %v646_v31 = vrot.slane %v644_v28, 1  ;;  %v1186_v45 = vshll.u32 %v2374_v40, 16 }
  0x2c   : > { %v600_v26 = vsel %vm504_vm0, %v595_v22, %v599_v24  ;;  %v647_v33 = vor.u32 %v646_v31, %v642_v30  ;;  %v1188_v48 = vrot.slane %v1186_v45, 1 }
  0x2d   : > { %894 = vrot.lane.b32.xlu1 %v846_v32, %s2418_s14  ;;  %655 = vrot.lane.b32.xlu0 %v540_v38, %s2418_s14 }
  0x31   : > { %607 = vrot.lane.b32.xlu1 %v552_v41, %s2419_s15  ;;  %605 = vrot.lane.b32.xlu0 %v540_v38, %s2419_s15  ;;  %v1181_v38 = vshll.u32 %v2372_v37, 16 }
  0x33   : > { %v1183_v44 = vrot.slane %v1181_v38, 1 }
  0x35   : > { %628 = vrot.lane.b32.xlu1 %v2565_v39, %s2417_s13  ;;  %626 = vrot.lane.b32.xlu0 %v2535_v17, %s2417_s13  ;;  %v1184_v46 = vor.u32 %v1183_v44, %v1179_v43 }
  0x37   : > { %v1189_v49 = vsel %vm504_vm0, %v1184_v46, %v1188_v48 }
  0x39   : > { %862 = vrot.lane.b32.xlu1 %v846_v32, %s2419_s15  ;;  %657 = vrot.lane.b32.xlu0 %v552_v41, %s2418_s14  ;;  %v649_v32 = vshll.u32 %v2663_v27, 16  ;;  %v890_v41 = vshrl.u32 %v2663_v27, 16 }
  0x3b   : > { %v651_v34 = vrot.slane %v649_v32, 1 }
  0x3d   : > { %864 = vrot.lane.b32.xlu1 %v848_v50, %s2419_s15  ;;  %659 = vrot.lane.b32.xlu0 %v564_v53, %s2418_s14  ;;  %v652_v36 = vsel %vm504_vm0, %v647_v33, %v651_v34 }
  0x41   : > { %880 = vrot.lane.b32.xlu1 %v2576_v42, %s2417_s13  ;;  %878 = vrot.lane.b32.xlu0 %v2544_v23, %s2417_s13 }
  0x45   : > { %898 = vrot.lane.b32.xlu1 %v850_v57, %s2418_s14  ;;  %896 = vrot.lane.b32.xlu0 %v848_v50, %s2418_s14  ;;  %v1310_v50 = vshrl.u32 %v2374_v40, 16 }
  0x49   : > { %611 = vrot.lane.b32.xlu1 %v576_v61, %s2419_s15  ;;  %609 = vrot.lane.b32.xlu0 %v564_v53, %s2419_s15 }
  0x4d   : > { %632 = vrot.lane.b32.xlu1 %v2613_v60, %s2417_s13  ;;  %630 = vrot.lane.b32.xlu0 %v2591_v47, %s2417_s13 }
  0x51   : > { %866 = vrot.lane.b32.xlu1 %v850_v57, %s2419_s15  ;;  %661 = vrot.lane.b32.xlu0 %v576_v61, %s2418_s14 }
  0x55   : > { %868 = vrot.lane.b32.xlu1 %v852_v11, %s2419_s15  ;;  %663 = vrot.lane.b32.xlu0 %v588_v14, %s2418_s14 }
  0x59   : > { %884 = vrot.lane.b32.xlu1 %v2619_v62, %s2417_s13  ;;  %882 = vrot.lane.b32.xlu0 %v2598_v51, %s2417_s13 }
  0x5d   : > { %902 = vrot.lane.b32.xlu1 %v854_v21, %s2418_s14  ;;  %900 = vrot.lane.b32.xlu0 %v852_v11, %s2418_s14 }
  0x61   : > { %615 = vrot.lane.b32.xlu1 %v600_v26, %s2419_s15  ;;  %613 = vrot.lane.b32.xlu0 %v588_v14, %s2419_s15 }
  0x65   : > { %636 = vrot.lane.b32.xlu1 %v2657_v25, %s2417_s13  ;;  %634 = vrot.lane.b32.xlu0 %v2629_v8, %s2417_s13 }
  0x69   : > { %870 = vrot.lane.b32.xlu1 %v854_v21, %s2419_s15  ;;  %665 = vrot.lane.b32.xlu0 %v600_v26, %s2418_s14 }
  0x6d   : > { %872 = vrot.lane.b32.xlu1 %v856_v35, %s2419_s15  ;;  %667 = vrot.lane.b32.xlu0 %v652_v36, %s2418_s14 }
  0x71   : > { %888 = vrot.lane.b32.xlu1 %v2663_v27, %s2417_s13  ;;  %886 = vrot.lane.b32.xlu0 %v2636_v12, %s2417_s13 }
  0x75   : > { %906 = vrot.lane.b32.xlu1 %v890_v41, %s2418_s14  ;;  %904 = vrot.lane.b32.xlu0 %v856_v35, %s2418_s14 }
  0x79   : > { %1173 = vrot.lane.b32.xlu1 %v2372_v37, %s2417_s13  ;;  %1166 = vrot.lane.b32.xlu0 %v652_v36, %s2419_s15 }
  0x7d   : > { %1306 = vrot.lane.b32.xlu1 %v890_v41, %s2419_s15  ;;  %1190 = vrot.lane.b32.xlu0 %v1189_v49, %s2418_s14  ;;  %s2421_s15 = smov 24  }
  0x81   : > { %1312 = vrot.lane.b32.xlu1 %v1310_v50, %s2418_s14  ;;  %1308 = vrot.lane.b32.xlu0 %v2374_v40, %s2417_s13  ;;  %s2420_s14 = smov 16  }
  0x8b   : > { %v875_v52 = vpop.permute.xlu0 %874  ;;  %v623_v53 = vpop.permute.xlu1 %622 }
  0x8f   : > { %v893_v54 = vpop.permute.xlu0 %892  ;;  %v625_v55 = vpop.permute.xlu1 %624 }
  0x93   : > { %v859_v56 = vpop.permute.xlu1 %858  ;;  %v602_v57 = vpop.permute.xlu0 %601 }
  0x94   : > { %v909_v58 = vsel %vm669_vm1, %v2520_v5, %v859_v56  ;;  %v671_v2 = vsel %vm669_vm1, %v2523_v6, %v602_v57 }
  0x95   : > { %v925_v61 = vsel %vm686_vm2, %v909_v58, %v875_v52  ;;  %v688_v10 = vsel %vm686_vm2, %v671_v2, %v623_v53 }
  0x96   : > { %v941_v7 = vsel %vm703_vm3, %v925_v61, %v893_v54 }
  0x97   : > { %v861_v59 = vpop.permute.xlu1 %860  ;;  %v604_v63 = vpop.permute.xlu0 %603  ;;  %v962_v18 = vshll.u32 %v941_v7, 16 }
  0x98   : > { %v911_v11 = vsel %vm669_vm1, %v2505_v0, %v861_v59  ;;  %v673_v5 = vsel %vm669_vm1, %v2508_v1, %v604_v63 }
  0x99   : > { %v690_v24 = vsel %vm686_vm2, %v673_v5, %v625_v55  ;;  %v964_v32 = vrot.slane %v962_v18, 1 }
  0x9b   : > { %v877_v4 = vpop.permute.xlu1 %876  ;;  %v654_v9 = vpop.permute.xlu0 %653 }
  0x9c   : > { %v705_v13 = vsel %vm703_vm3, %v688_v10, %v654_v9  ;;  %v927_v14 = vsel %vm686_vm2, %v911_v11, %v877_v4 }
  0x9d   : > { %2235 = vmatprep.mubr.msk.bf16.mxu0 %vm728_vm4, %v705_v13  ;;  %v958_v6 = vshll.u32 %v705_v13, 16  ;;  %v956_v21 = vshrl.u32 %v705_v13, 16 }
  0x9f   : > { %v895_v16 = vpop.permute.xlu1 %894  ;;  %v960_v22 = vrot.slane %v958_v6, 1  ;;  %v656_v26 = vpop.permute.xlu0 %655 }
  0xa0   : > { %v943_v19 = vsel %vm703_vm3, %v927_v14, %v895_v16  ;;  %v2719_v0 = vsel %vm703_vm3, %v690_v24, %v656_v26 }
  0xa1   : > { %v972_v1 = vshll.u32 %v943_v19, 16  ;;  %v968_v28 = vshll.u32 %v2719_v0, 16  ;;  %2236 = vmatmul.mubr.msk.bf16.vlgmr.msra.gmra.mrb[0].mxu0 %vm728_vm4, %v2719_v0  ;;  %v961_v31 = vor.u32 %v960_v22, %v956_v21  ;;  %v966_v33 = vshrl.u32 %v2719_v0, 16 }
  0xa2   : > { %2270 = vmatpush3.bf16.msra.mxu0 %v2645_v15 }
  0xa3   : > { %v608_v30 = vpop.permute.xlu1 %607  ;;  %v970_v34 = vrot.slane %v968_v28, 1  ;;  %v606_v35 = vpop.permute.xlu0 %605  ;;  %v965_v36 = vsel %vm504_vm0, %v961_v31, %v964_v32  ;;  %v974_v37 = vrot.slane %v972_v1, 1 }
  0xa4   : > { %2253 = vmatprep.mubr.msk.bf16.mxu1 %vm728_vm4, %v965_v36  ;;  %v675_v15 = vsel %vm669_vm1, %v2516_v3, %v606_v35  ;;  %v677_v50 = vsel %vm669_vm1, %v2535_v17, %v608_v30 }
  0xa5   : > { %v971_v38 = vor.u32 %v970_v34, %v966_v33 }
  0xa7   : > { %v629_v40 = vpop.permute.xlu1 %628  ;;  %v627_v41 = vpop.permute.xlu0 %626  ;;  %v2729_v43 = vsel %vm504_vm0, %v971_v38, %v974_v37 }
  0xa8   : > { %2254 = vmatmul.mubr.msk.bf16.vlgmr.msra.gmra.mrb[0].mxu1 %vm728_vm4, %v2729_v43  ;;  %v692_v45 = vsel %vm686_vm2, %v675_v15, %v627_v41  ;;  %v694_v52 = vsel %vm686_vm2, %v677_v50, %v629_v40 }
  0xa9   : > { %2288 = vmatpush3.bf16.msra.mxu1 %v2671_v29 }
  0xab   : > { %v863_v44 = vpop.permute.xlu1 %862  ;;  %v658_v46 = vpop.permute.xlu0 %657 }
  0xac   : > { %v2738_v48 = vsel %vm703_vm3, %v692_v45, %v658_v46  ;;  %v913_v59 = vsel %vm669_vm1, %v2538_v20, %v863_v44 }
  0xad   : > { %2239 = vmatprep.mubr.msk.bf16.mxu0 %vm728_vm4, %v2738_v48  ;;  %v978_v55 = vshll.u32 %v2738_v48, 16 }
  0xaf   : > { %v865_v49 = vpop.permute.xlu1 %864  ;;  %v660_v53 = vpop.permute.xlu0 %659  ;;  %v980_v2 = vrot.slane %v978_v55, 1 }
  0xb0   : > { %v2746_v29 = vsel %vm703_vm3, %v694_v52, %v660_v53  ;;  %v915_v57 = vsel %vm669_vm1, %v2544_v23, %v865_v49  ;;  %v976_v23 = vshrl.u32 %v2738_v48, 16 }
  0xb1   : > { %2240 = vmatmul.mubr.msk.bf16.gmra.mrb[4].mxu0 %vm728_vm4, %v2746_v29  ;;  %v988_v54 = vshll.u32 %v2746_v29, 16  ;;  %v986_v10 = vshrl.u32 %v2746_v29, 16 }
  0xb2   : > { %v981_v16 = vor.u32 %v980_v2, %v976_v23 }
  0xb3   : > { %v881_v3 = vpop.permute.xlu1 %880  ;;  %v879_v56 = vpop.permute.xlu0 %878  ;;  %v990_v61 = vrot.slane %v988_v54, 1 }
  0xb4   : > { %v931_v17 = vsel %vm686_vm2, %v915_v57, %v881_v3  ;;  %v929_v4 = vsel %vm686_vm2, %v913_v59, %v879_v56 }
  0xb5   : > { %v991_v6 = vor.u32 %v990_v61, %v986_v10 }
  0xb7   : > { %v899_v58 = vpop.permute.xlu1 %898  ;;  %v897_v9 = vpop.permute.xlu0 %896 }
  0xb8   : > { %v947_v63 = vsel %vm703_vm3, %v931_v17, %v899_v58  ;;  %v945_v11 = vsel %vm703_vm3, %v929_v4, %v897_v9 }
  0xb9   : > { %v992_v7 = vshll.u32 %v947_v63, 16  ;;  %v982_v13 = vshll.u32 %v945_v11, 16 }
  0xbb   : > { %v994_v5 = vrot.slane %v992_v7, 1  ;;  %v612_v14 = vpop.permute.xlu1 %611  ;;  %v984_v20 = vrot.slane %v982_v13, 1  ;;  %v610_v18 = vpop.permute.xlu0 %609 }
  0xbc   : > { %v679_v1 = vsel %vm669_vm1, %v2565_v39, %v610_v18  ;;  %v681_v33 = vsel %vm669_vm1, %v2591_v47, %v612_v14 }
  0xbd   : > { %v2763_v19 = vsel %vm504_vm0, %v991_v6, %v994_v5  ;;  %v2766_v21 = vsel %vm504_vm0, %v981_v16, %v984_v20 }
  0xbe   : > { %2257 = vmatprep.mubr.msk.bf16.mxu1 %vm728_vm4, %v2766_v21 }
  0xbf   : > { %v633_v22 = vpop.permute.xlu1 %632  ;;  %2258 = vmatmul.mubr.msk.bf16.gmra.mrb[4].mxu1 %vm728_vm4, %v2763_v19  ;;  %v631_v24 = vpop.permute.xlu0 %630 }
  0xc0   : > { %v696_v28 = vsel %vm686_vm2, %v679_v1, %v631_v24  ;;  %v698_v34 = vsel %vm686_vm2, %v681_v33, %v633_v22 }
  0xc3   : > { %v867_v26 = vpop.permute.xlu1 %866  ;;  %v662_v30 = vpop.permute.xlu0 %661 }
  0xc4   : > { %v2776_v31 = vsel %vm703_vm3, %v696_v28, %v662_v30  ;;  %v917_v15 = vsel %vm669_vm1, %v2576_v42, %v867_v26 }
  0xc5   : > { %2243 = vmatprep.mubr.msk.bf16.mxu0 %vm728_vm4, %v2776_v31  ;;  %v998_v38 = vshll.u32 %v2776_v31, 16 }
  0xc7   : > { %v869_v32 = vpop.permute.xlu1 %868  ;;  %v664_v35 = vpop.permute.xlu0 %663  ;;  %v1000_v49 = vrot.slane %v998_v38, 1 }
  0xc8   : > { %v2784_v36 = vsel %vm703_vm3, %v698_v34, %v664_v35  ;;  %v919_v41 = vsel %vm669_vm1, %v2598_v51, %v869_v32  ;;  %v996_v51 = vshrl.u32 %v2776_v31, 16 }
  0xc9   : > { %2244 = vmatmul.mubr.msk.bf16.gmra.mrb[8].mxu0 %vm728_vm4, %v2784_v36  ;;  %v1008_v37 = vshll.u32 %v2784_v36, 16  ;;  %v1006_v3 = vshrl.u32 %v2784_v36, 16 }
  0xca   : > { %v1001_v58 = vor.u32 %v1000_v49, %v996_v51 }
  0xcb   : > { %v885_v39 = vpop.permute.xlu1 %884  ;;  %v883_v40 = vpop.permute.xlu0 %882  ;;  %v1010_v45 = vrot.slane %v1008_v37, 1 }
  0xcc   : > { %v935_v47 = vsel %vm686_vm2, %v919_v41, %v885_v39  ;;  %v933_v50 = vsel %vm686_vm2, %v917_v15, %v883_v40 }
  0xcd   : > { %v1011_v17 = vor.u32 %v1010_v45, %v1006_v3 }
  0xcf   : > { %v903_v44 = vpop.permute.xlu1 %902  ;;  %v901_v53 = vpop.permute.xlu0 %900 }
  0xd0   : > { %v951_v46 = vsel %vm703_vm3, %v935_v47, %v903_v44  ;;  %v949_v54 = vsel %vm703_vm3, %v933_v50, %v901_v53 }
  0xd1   : > { %v1012_v52 = vshll.u32 %v951_v46, 16  ;;  %v1002_v56 = vshll.u32 %v949_v54, 16 }
  0xd3   : > { %v1014_v55 = vrot.slane %v1012_v52, 1  ;;  %v616_v57 = vpop.permute.xlu1 %615  ;;  %v1004_v42 = vrot.slane %v1002_v56, 1  ;;  %v614_v59 = vpop.permute.xlu0 %613 }
  0xd4   : > { %v683_v9 = vsel %vm669_vm1, %v2613_v60, %v614_v59  ;;  %v685_v13 = vsel %vm669_vm1, %v2629_v8, %v616_v57 }
  0xd5   : > { %v2801_v61 = vsel %vm504_vm0, %v1011_v17, %v1014_v55  ;;  %v2804_v63 = vsel %vm504_vm0, %v1001_v58, %v1004_v42 }
  0xd6   : > { %2261 = vmatprep.mubr.msk.bf16.mxu1 %vm728_vm4, %v2804_v63 }
  0xd7   : > { %v637_v2 = vpop.permute.xlu1 %636  ;;  %2262 = vmatmul.mubr.msk.bf16.gmra.mrb[8].mxu1 %vm728_vm4, %v2801_v61  ;;  %v635_v4 = vpop.permute.xlu0 %634 }
  0xd8   : > { %v700_v10 = vsel %vm686_vm2, %v683_v9, %v635_v4  ;;  %v702_v14 = vsel %vm686_vm2, %v685_v13, %v637_v2 }
  0xdb   : > { %v871_v7 = vpop.permute.xlu1 %870  ;;  %v666_v11 = vpop.permute.xlu0 %665 }
  0xdc   : > { %v717_v23 = vsel %vm703_vm3, %v700_v10, %v666_v11  ;;  %v921_v1 = vsel %vm669_vm1, %v2619_v62, %v871_v7 }
  0xdd   : > { %2247 = vmatprep.mubr.msk.bf16.mxu0 %vm728_vm4, %v717_v23  ;;  %v1018_v18 = vshll.u32 %v717_v23, 16  ;;  %v1016_v37 = vshrl.u32 %v717_v23, 16 }
  0xdf   : > { %v873_v5 = vpop.permute.xlu1 %872  ;;  %v668_v6 = vpop.permute.xlu0 %667  ;;  %v1020_v32 = vrot.slane %v1018_v18, 1 }
  0xe0   : > { %v719_v16 = vsel %vm703_vm3, %v702_v14, %v668_v6  ;;  %v923_v24 = vsel %vm669_vm1, %v2636_v12, %v873_v5 }
  0xe1   : > { %2248 = vmatmul.mubr.msk.bf16.gmra.mrb[12].mxu0 %vm728_vm4, %v719_v16  ;;  %v1028_v60 = vshll.u32 %v719_v16, 16  ;;  %v1021_v62 = vor.u32 %v1020_v32, %v1016_v37 }
  0xe2   : > { %2271 = vmatprep.mubr.msk.bf16.mxu0 %vm728_vm4, %v2719_v0  ;;  %v1026_v0 = vshrl.u32 %v719_v16, 16 }
  0xe3   : > { %v889_v20 = vpop.permute.xlu1 %888  ;;  %v887_v22 = vpop.permute.xlu0 %886  ;;  %v1030_v28 = vrot.slane %v1028_v60, 1 }
  0xe4   : > { %v939_v26 = vsel %vm686_vm2, %v923_v24, %v889_v20  ;;  %v937_v33 = vsel %vm686_vm2, %v921_v1, %v887_v22 }
  0xe5   : > { %v1031_v40 = vor.u32 %v1030_v28, %v1026_v0 }
  0xe7   : > { %v907_v8 = vpop.permute.xlu1 %906  ;;  %v905_v35 = vpop.permute.xlu0 %904 }
  0xe8   : > { %v955_v30 = vsel %vm703_vm3, %v939_v26, %v907_v8  ;;  %v953_v39 = vsel %vm703_vm3, %v937_v33, %v905_v35 }
  0xe9   : > { %v1032_v34 = vshll.u32 %v955_v30, 16  ;;  %v1022_v12 = vshll.u32 %v953_v39, 16  ;;  %2272 = vmatmul.mubr.msk.bf16.vlgmr.msra.gmra.mrb[16].mxu0 %vm728_vm4, %v2738_v48 }
  0xea   : > { %2275 = vmatprep.mubr.msk.bf16.mxu0 %vm728_vm4, %v2746_v29 }
  0xeb   : > { %v1034_v38 = vrot.slane %v1032_v34, 1  ;;  %v1024_v41 = vrot.slane %v1022_v12, 1  ;;  %v1167_v15 = vpop.permute.xlu0 %1166  ;;  %v1174_v48 = vpop.permute.xlu1 %1173 }
  0xec   : > { %v1193_v45 = vsel %vm669_vm1, %v2657_v25, %v1167_v15 }
  0xed   : > { %v1035_v47 = vsel %vm504_vm0, %v1031_v40, %v1034_v38  ;;  %v1025_v44 = vsel %vm504_vm0, %v1021_v62, %v1024_v41 }
  0xee   : > { %2265 = vmatprep.mubr.msk.bf16.mxu1 %vm728_vm4, %v1025_v44 }
  0xef   : > { %2266 = vmatmul.mubr.msk.bf16.gmra.mrb[12].mxu1 %vm728_vm4, %v1035_v47  ;;  %v1191_v29 = vpop.permute.xlu0 %1190  ;;  %v1307_v46 = vpop.permute.xlu1 %1306 }
  0xf0   : > { %2289 = vmatprep.mubr.msk.bf16.mxu1 %vm728_vm4, %v2729_v43  ;;  %v1195_v43 = vsel %vm686_vm2, %v1193_v45, %v1174_v48 }
  0xf1   : > { %2276 = vmatmul.mubr.msk.bf16.gmra.mrb[20].mxu0 %vm728_vm4, %v2776_v31  ;;  %v1315_v31 = vsel %vm669_vm1, %v2663_v27, %v1307_v46  ;;  %v1197_v49 = vsel %vm703_vm3, %v1195_v43, %v1191_v29 }
  0xf2   : > { %2279 = vmatprep.mubr.msk.bf16.mxu0 %vm728_vm4, %v2784_v36  ;;  %v1322_v25 = vshll.u32 %v1197_v49, 16  ;;  %v1320_v52 = vshrl.u32 %v1197_v49, 16 }
  0xf3   : > { %v1309_v36 = vpop.permute.xlu0 %1308  ;;  %v1313_v50 = vpop.permute.xlu1 %1312 }
  0xf4   : > { %v1324_v53 = vrot.slane %v1322_v25, 1 }
  0xf6   : > { %v1325_v3 = vor.u32 %v1324_v53, %v1320_v52 }
  0xf7   : > { %2290 = vmatmul.mubr.msk.bf16.vlgmr.msra.gmra.mrb[16].mxu1 %vm728_vm4, %v2766_v21  ;;  %v1317_v21 = vsel %vm686_vm2, %v1315_v31, %v1309_v36 }
  0xf8   : > { %2293 = vmatprep.mubr.msk.bf16.mxu1 %vm728_vm4, %v2763_v19  ;;  %v1319_v19 = vsel %vm703_vm3, %v1317_v21, %v1313_v50 }
  0xf9   : > { %2280 = vmatmul.mubr.msk.bf16.gmra.mrb[24].mxu0 %vm728_vm4, %v717_v23  ;;  %v1326_v27 = vshll.u32 %v1319_v19, 16 }
  0xfa   : > { %2283 = vmatprep.mubr.msk.bf16.mxu0 %vm728_vm4, %v719_v16 }
  0xfb   : > { %v1328_v54 = vrot.slane %v1326_v27, 1 }
  0xfd   : > { %v1329_v51 = vsel %vm504_vm0, %v1325_v3, %v1328_v54 }
  0xff   : > { %2294 = vmatmul.mubr.msk.bf16.gmra.mrb[20].mxu1 %vm728_vm4, %v2804_v63 }
 0x100   : > { %2297 = vmatprep.mubr.msk.bf16.mxu1 %vm728_vm4, %v2801_v61 }
 0x101   : > { %2284 = vmatmul.mubr.msk.bf16.gmra.mrb[28].mxu0 %vm728_vm4, %v1197_v49 }
 0x107   : > { %2298 = vmatmul.mubr.msk.bf16.gmra.mrb[24].mxu1 %vm728_vm4, %v1025_v44 }
 0x108   : > { %2301 = vmatprep.mubr.msk.bf16.mxu1 %vm728_vm4, %v1035_v47 }
 0x10f   : > { %2302 = vmatmul.mubr.msk.bf16.gmra.mrb[28].mxu1 %vm728_vm4, %v1329_v51 }
 0x174   : > { %v2867_v55 = vpop.f32.mrb[0].mxu0 }
 0x175   : > { %v2869_v56 = vpop.f32.mrb[1].mxu0 }
 0x176   : > { %v2871_v57 = vpop.f32.mrb[2].mxu0 }
 0x177   : > { %v2873_v17 = vpop.f32.mrb[3].mxu0 }
 0x17b   : > { %v2255_v58 = vpop.f32.mrb[0].mxu1 }
 0x17c   : > { %1459 = vrot.lane.b32.xlu0 %v2255_v58, %s2417_s13  ;;  %v1103_v42 = vpop.f32.mrb[1].mxu1 }
 0x17d   : > { %v2256_v59 = vpop.f32.mrb[2].mxu1 }
 0x17e   : > { %v1106_v61 = vpop.f32.mrb[3].mxu1 }
 0x17f   : > { %1457 = vrot.lane.b32.xlu1 %v1106_v61, %s2417_s13 }
 0x180   : > { %1455 = vrot.lane.b32.xlu0 %v1103_v42, %s2417_s13 }
 0x184   : > { %1461 = vrot.lane.b32.xlu0 %v2256_v59, %s2417_s13  ;;  %v2879_v63 = vpop.f32.mrb[4].mxu0 }
 0x185   : > { %v2881_v2 = vpop.f32.mrb[5].mxu0 }
 0x186   : > { %v2883_v4 = vpop.f32.mrb[6].mxu0 }
 0x187   : > { %v2885_v7 = vpop.f32.mrb[7].mxu0 }
 0x192   : > { %v2259_v9 = vpop.f32.mrb[4].mxu1 }
 0x193   : > { %1467 = vrot.lane.b32.xlu1 %v2259_v9, %s2417_s13  ;;  %v1119_v10 = vpop.f32.mrb[5].mxu1 }
 0x194   : > { %v2260_v11 = vpop.f32.mrb[6].mxu1 }
 0x195   : > { %1469 = vrot.lane.b32.xlu0 %v2260_v11, %s2417_s13  ;;  %v1122_v23 = vpop.f32.mrb[7].mxu1 }
 0x197   : > { %1463 = vrot.lane.b32.xlu1 %v1119_v10, %s2417_s13 }
 0x199   : > { %1465 = vrot.lane.b32.xlu0 %v1122_v23, %s2417_s13 }
 0x19c   : > { %v2891_v5 = vpop.f32.mrb[8].mxu0 }
 0x19d   : > { %v2893_v13 = vpop.f32.mrb[9].mxu0 }
 0x19e   : > { %v2895_v14 = vpop.f32.mrb[10].mxu0 }
 0x19f   : > { %v2897_v6 = vpop.f32.mrb[11].mxu0 }
 0x1aa   : > { %v2263_v16 = vpop.f32.mrb[8].mxu1 }
 0x1ab   : > { %1475 = vrot.lane.b32.xlu1 %v2263_v16, %s2417_s13  ;;  %v1135_v20 = vpop.f32.mrb[9].mxu1 }
 0x1ac   : > { %v2264_v60 = vpop.f32.mrb[10].mxu1 }
 0x1ad   : > { %1477 = vrot.lane.b32.xlu0 %v2264_v60, %s2417_s13  ;;  %v1138_v18 = vpop.f32.mrb[11].mxu1 }
 0x1af   : > { %1471 = vrot.lane.b32.xlu1 %v1135_v20, %s2417_s13 }
 0x1b1   : > { %1473 = vrot.lane.b32.xlu0 %v1138_v18, %s2417_s13 }
 0x1b4   : > { %v2903_v22 = vpop.f32.mrb[12].mxu0 }
 0x1b5   : > { %v2905_v24 = vpop.f32.mrb[13].mxu0 }
 0x1b6   : > { %v2907_v26 = vpop.f32.mrb[14].mxu0 }
 0x1b7   : > { %v2909_v8 = vpop.f32.mrb[15].mxu0 }
 0x1bc   : > { %v2273_v1 = vpop.f32.mrb[16].mxu0 }
 0x1bd   : > { %v1243_v28 = vpop.f32.mrb[17].mxu0 }
 0x1be   : > { %1519 = vrot.lane.b32.xlu0 %v1243_v28, %s2420_s14  ;;  %v2274_v30 = vpop.f32.mrb[18].mxu0 }
 0x1bf   : > { %v1246_v32 = vpop.f32.mrb[19].mxu0 }
 0x1c2   : > { %v2267_v33 = vpop.f32.mrb[12].mxu1 }
 0x1c3   : > { %1483 = vrot.lane.b32.xlu1 %v2267_v33, %s2417_s13  ;;  %v1151_v34 = vpop.f32.mrb[13].mxu1 }
 0x1c4   : > { %v2268_v35 = vpop.f32.mrb[14].mxu1  ;;  %v2277_v0 = vpop.f32.mrb[20].mxu0 }
 0x1c5   : > { %v1259_v39 = vpop.f32.mrb[21].mxu0  ;;  %1485 = vrot.lane.b32.xlu0 %v2268_v35, %s2417_s13  ;;  %v1154_v37 = vpop.f32.mrb[15].mxu1 }
 0x1c6   : > { %v2278_v38 = vpop.f32.mrb[22].mxu0 }
 0x1c7   : > { %v1262_v12 = vpop.f32.mrb[23].mxu0  ;;  %1523 = vrot.lane.b32.xlu1 %v2273_v1, %s2420_s14 }
 0x1c9   : > { %1525 = vrot.lane.b32.xlu0 %v2274_v30, %s2420_s14 }
 0x1ca   : > { %v2291_v40 = vpop.f32.mrb[16].mxu1 }
 0x1cb   : > { %1479 = vrot.lane.b32.xlu1 %v1151_v34, %s2417_s13  ;;  %v1376_v62 = vpop.f32.mrb[17].mxu1 }
 0x1cc   : > { %v2281_v41 = vpop.f32.mrb[24].mxu0  ;;  %v2292_v47 = vpop.f32.mrb[18].mxu1 }
 0x1cd   : > { %v1275_v44 = vpop.f32.mrb[25].mxu0  ;;  %1481 = vrot.lane.b32.xlu0 %v1154_v37, %s2417_s13  ;;  %v1379_v15 = vpop.f32.mrb[19].mxu1  ;;  %s2086_s13 = sshll.u32 %s2399_s21, 4  ;;  %s3187_s21 = smov (!%p397_p9, %s2399_s21), 1 }
 0x1ce   : > { %v2282_v48 = vpop.f32.mrb[26].mxu0  ;;  %p388_p8 = scmp.lt.s32.totalorder %s2086_s13, 31  ;;  %s400_s10 = sadd.s32 %s2089_s9, %s3187_s21 }
 0x1cf   : > { %v1278_v29 = vpop.f32.mrb[27].mxu0  ;;  %1521 = vrot.lane.b32.xlu1 %v1246_v32, %s2420_s14  ;;  %s401_s12 = scalar_lea.vmem %s3168_s5, %s400_s10 }
 0x1d0   : > { %s3185_s13 = smov (!%p388_p8, %s2086_s13), 31 }
 0x1d1   : > { %1589 = vrot.lane.b32.xlu0 %v2292_v47, %s2421_s15  ;;  %s391_s18 = sadd.s32 %s2087_s17, %s3185_s13 }
 0x1d2   : > { %v2295_v45 = vpop.f32.mrb[20].mxu1  ;;  %s2088_s28 = sshll.u32 %s391_s18, 2 }
 0x1d3   : > { %1587 = vrot.lane.b32.xlu1 %v2291_v40, %s2421_s15  ;;  %v1392_v46 = vpop.f32.mrb[21].mxu1  ;;  %s2995_s8 = scalar_lea.vmem %s3167_s4, %s2088_s28 }
 0x1d4   : > { %v2296_v43 = vpop.f32.mrb[22].mxu1  ;;  %v2285_v31 = vpop.f32.mrb[28].mxu0 }
 0x1d5   : > { %1585 = vrot.lane.b32.xlu0 %v1379_v15, %s2421_s15  ;;  %v1395_v36 = vpop.f32.mrb[23].mxu1  ;;  %v1291_v49 = vpop.f32.mrb[29].mxu0 }
 0x1d6   : > { %v2286_v21 = vpop.f32.mrb[30].mxu0 }
 0x1d7   : > { %1583 = vrot.lane.b32.xlu1 %v1376_v62, %s2421_s15  ;;  %v1294_v50 = vpop.f32.mrb[31].mxu0 }
 0x1d9   : > { %1533 = vrot.lane.b32.xlu0 %v2278_v38, %s2420_s14 }
 0x1da   : > { %v2299_v25 = vpop.f32.mrb[24].mxu1 }
 0x1db   : > { %1531 = vrot.lane.b32.xlu1 %v2277_v0, %s2420_s14  ;;  %v1408_v19 = vpop.f32.mrb[25].mxu1 }
 0x1dc   : > { %v2300_v52 = vpop.f32.mrb[26].mxu1 }
 0x1dd   : > { %1529 = vrot.lane.b32.xlu0 %v1262_v12, %s2420_s14  ;;  %v1411_v53 = vpop.f32.mrb[27].mxu1 }
 0x1df   : > { %1527 = vrot.lane.b32.xlu1 %v1259_v39, %s2420_s14 }
 0x1e1   : > { %1597 = vrot.lane.b32.xlu0 %v2296_v43, %s2421_s15 }
 0x1e2   : > { %v2303_v27 = vpop.f32.mrb[28].mxu1 }
 0x1e3   : > { %1595 = vrot.lane.b32.xlu1 %v2295_v45, %s2421_s15  ;;  %v1424_v3 = vpop.f32.mrb[29].mxu1 }
 0x1e4   : > { %v2304_v54 = vpop.f32.mrb[30].mxu1 }
 0x1e5   : > { %1593 = vrot.lane.b32.xlu0 %v1395_v36, %s2421_s15  ;;  %v1427_v51 = vpop.f32.mrb[31].mxu1 }
 0x1e7   : > { %1591 = vrot.lane.b32.xlu1 %v1392_v46, %s2421_s15 }
 0x1e9   : > { %1541 = vrot.lane.b32.xlu0 %v2282_v48, %s2420_s14 }
 0x1eb   : > { %1539 = vrot.lane.b32.xlu1 %v2281_v41, %s2420_s14 }
 0x1ed   : > { %1537 = vrot.lane.b32.xlu0 %v1278_v29, %s2420_s14 }
 0x1ee   : > { %v1460_v58 = vpop.permute.xlu0 %1459 }
 0x1ef   : > { %1535 = vrot.lane.b32.xlu1 %v1275_v44, %s2420_s14  ;;  %v1633_v40 = vsel %vm686_vm2, %v2867_v55, %v1460_v58 }
 0x1f1   : > { %1605 = vrot.lane.b32.xlu0 %v2300_v52, %s2421_s15  ;;  %v1458_v61 = vpop.permute.xlu1 %1457 }
 0x1f2   : > { %v1456_v42 = vpop.permute.xlu0 %1455 }
 0x1f3   : > { %1603 = vrot.lane.b32.xlu1 %v2299_v25, %s2421_s15  ;;  %v1631_v46 = vsel %vm686_vm2, %v2869_v56, %v1456_v42 }
 0x1f5   : > { %1601 = vrot.lane.b32.xlu0 %v1411_v53, %s2421_s15 }
 0x1f6   : > { %v1462_v59 = vpop.permute.xlu0 %1461 }
 0x1f7   : > { %1599 = vrot.lane.b32.xlu1 %v1408_v19, %s2421_s15 }
 0x1f9   : > { %1545 = vrot.lane.b32.xlu0 %v1294_v50, %s2420_s14 }
 0x1fb   : > { %1547 = vrot.lane.b32.xlu1 %v2285_v31, %s2420_s14 }
 0x1fd   : > { %1609 = vrot.lane.b32.xlu0 %v1427_v51, %s2421_s15 }
 0x1ff   : > { %1543 = vrot.lane.b32.xlu1 %v1291_v49, %s2420_s14 }
 0x201   : > { %1549 = vrot.lane.b32.xlu0 %v2286_v21, %s2420_s14 }
 0x203   : > { %1607 = vrot.lane.b32.xlu1 %v1424_v3, %s2421_s15 }
 0x205   : > { %v2949_v10 = vpop.permute.xlu1 %1467 }
 0x207   : > { %1611 = vrot.lane.b32.xlu1 %v2303_v27, %s2421_s15  ;;  %v2947_v9 = vpop.permute.xlu0 %1469 }
 0x209   : > { %v2953_v23 = vpop.permute.xlu1 %1463 }
 0x20b   : > { %1613 = vrot.lane.b32.xlu1 %v2304_v54, %s2421_s15  ;;  %v2951_v11 = vpop.permute.xlu0 %1465  ;;  %s408_s15 = scalar_lea.vmem %s3169_s6, %s400_s10 }
 0x21d   : > { %v2957_v20 = vpop.permute.xlu1 %1475 }
 0x21f   : > { %v2955_v16 = vpop.permute.xlu0 %1477 }
 0x221   : > { %v2961_v18 = vpop.permute.xlu1 %1471 }
 0x223   : > { %v2959_v60 = vpop.permute.xlu0 %1473 }
 0x230   : > { %v1520_v1 = vpop.permute.xlu0 %1519 }
 0x231   : > { %v1647_v43 = vsel %vm728_vm4, %v1631_v46, %v1520_v1 }
 0x235   : > { %v1484_v28 = vpop.permute.xlu1 %1483 }
 0x236   : > { %v2966_v30 = vsel %vm686_vm2, %v2903_v22, %v1484_v28  ;;  %v1634_v22 = vsel %vm686_vm2, %v2871_v57, %v1462_v59  ;;  %v1632_v57 = vsel %vm686_vm2, %v2873_v17, %v1458_v61 }
 0x237   : > { %v1486_v32 = vpop.permute.xlu0 %1485 }
 0x238   : > { %v2970_v33 = vsel %vm686_vm2, %v2907_v26, %v1486_v32  ;;  %v2982_v26 = vld [vmem:[%s3166_s3] ss:$0 sm:$0xff] }
 0x239   : > { %v1524_v34 = vpop.permute.xlu1 %1523 }
 0x23a   : > { %v1649_v41 = vsel %vm728_vm4, %v1633_v40, %v1524_v34 }
 0x23b   : > { %v1526_v35 = vpop.permute.xlu0 %1525 }
 0x23c   : > { %v1650_v38 = vsel %vm728_vm4, %v1634_v22, %v1526_v35 }
 0x23d   : > { %v2972_v0 = vpop.permute.xlu1 %1479 }
 0x23f   : > { %v2975_v39 = vpop.permute.xlu0 %1481 }
 0x241   : > { %v1522_v37 = vpop.permute.xlu1 %1521 }
 0x242   : > { %v1648_v15 = vsel %vm728_vm4, %v1632_v57, %v1522_v37  ;;  %v1637_v57 = vsel %vm686_vm2, %v2879_v63, %v2949_v10 }
 0x243   : > { %v1590_v12 = vpop.permute.xlu0 %1589 }
 0x244   : > { %v1667_v62 = vsel %vm1663_vm5, %v1650_v38, %v1590_v12  ;;  %v1638_v38 = vsel %vm686_vm2, %v2883_v4, %v2947_v9  ;;  %v1636_v9 = vsel %vm686_vm2, %v2885_v7, %v2951_v11 }
 0x245   : > { %v1690_v47 = vadd.f32 %v2982_v26, %v1667_v62  ;;  %v1588_v44 = vpop.permute.xlu1 %1587 }
 0x246   : > { %v1666_v55 = vsel %vm1663_vm5, %v1649_v41, %v1588_v44 }
 0x247   : > { %v2182_v48 = vpack.c.bf16 %v1690_v47, %v1690_v47  ;;  %v1689_v29 = vadd.f32 %v2982_v26, %v1666_v55  ;;  %v1586_v45 = vpop.permute.xlu0 %1585  ;;  %v1827_v42 = vmul.f32 %v1690_v47, %v1690_v47  ;;  %v1790_v35 = vsel %vm1784_vm7, %v1690_v47, 0.0 }
 0x248   : > { %v1665_v17 = vsel %vm1663_vm5, %v1648_v15, %v1586_v45 }
 0x249   : > { %1771 = vst.msk [vmem:[%s2995_s8 + $0xc] sm:$0xf] %vm1767_vm6, %v2182_v48  ;;  %v2181_v31 = vpack.c.bf16 %v1689_v29, %v1689_v29  ;;  %v1584_v36 = vpop.permute.xlu1 %1583  ;;  %v1688_v49 = vadd.f32 %v2982_v26, %v1665_v17  ;;  %v1826_v56 = vmul.f32 %v1689_v29, %v1689_v29  ;;  %v1788_v59 = vsel %vm1784_vm7, %v1689_v29, 0.0 }
 0x24a   : > { %v1664_v21 = vsel %vm1663_vm5, %v1647_v43, %v1584_v36  ;;  %v1845_v62 = vsel %vm1784_vm7, %v1827_v42, 0.0  ;;  %v1635_v17 = vsel %vm686_vm2, %v2881_v2, %v2953_v23 }
 0x24b   : > { %1770 = vst.msk [vmem:[%s2995_s8 + $0x8] sm:$0xf] %vm1767_vm6, %v2181_v31  ;;  %v1687_v50 = vadd.f32 %v2982_v26, %v1664_v21  ;;  %v1534_v25 = vpop.permute.xlu0 %1533  ;;  %v2180_v19 = vpack.c.bf16 %v1688_v49, %v1688_v49  ;;  %v1825_v52 = vmul.f32 %v1688_v49, %v1688_v49  ;;  %v1786_v53 = vsel %vm1784_vm7, %v1688_v49, 0.0 }
 0x24c   : > { %v1843_v37 = vsel %vm1784_vm7, %v1826_v56, 0.0  ;;  %v1654_v41 = vsel %vm728_vm4, %v1638_v38, %v1534_v25 }
 0x24d   : > { %v2179_v27 = vpack.c.bf16 %v1687_v50, %v1687_v50  ;;  %v1785_v3 = vsel %vm1784_vm7, %v1687_v50, 0.0  ;;  %v1824_v54 = vmul.f32 %v1687_v50, %v1687_v50  ;;  %v1532_v51 = vpop.permute.xlu1 %1531  ;;  %1769 = vst.msk [vmem:[%s2995_s8 + $0x4] sm:$0xf] %vm1767_vm6, %v2180_v19  ;;  %v1841_v61 = vsel %vm1784_vm7, %v1825_v52, 0.0 }
 0x24e   : > { %v1787_v58 = vadd.f32 %v1786_v53, %v1785_v3  ;;  %v1653_v15 = vsel %vm728_vm4, %v1637_v57, %v1532_v51 }
 0x24f   : > { %1768 = vst.msk [vmem:[%s2995_s8] sm:$0xf] %vm1767_vm6, %v2179_v27  ;;  %v1840_v1 = vsel %vm1784_vm7, %v1824_v54, 0.0  ;;  %v1530_v28 = vpop.permute.xlu0 %1529 }
 0x250   : > { %v1789_v32 = vadd.f32 %v1788_v59, %v1787_v58  ;;  %v1842_v34 = vadd.f32 %v1841_v61, %v1840_v1  ;;  %v1652_v45 = vsel %vm728_vm4, %v1636_v9, %v1530_v28 }
 0x251   : > { %v1528_v22 = vpop.permute.xlu1 %1527 }
 0x252   : > { %v1844_v12 = vadd.f32 %v1843_v37, %v1842_v34  ;;  %v1791_v40 = vadd.f32 %v1790_v35, %v1789_v32  ;;  %v1651_v31 = vsel %vm728_vm4, %v1635_v17, %v1528_v22  ;;  %v1642_v32 = vsel %vm686_vm2, %v2895_v14, %v2955_v16 }
 0x253   : > { %v1598_v44 = vpop.permute.xlu0 %1597 }
 0x254   : > { %v1671_v47 = vsel %vm1663_vm5, %v1654_v41, %v1598_v44  ;;  %v1846_v55 = vadd.f32 %v1845_v62, %v1844_v12 }
 0x255   : > { %v1694_v48 = vadd.f32 %v2982_v26, %v1671_v47  ;;  %v1596_v4 = vpop.permute.xlu1 %1595 }
 0x256   : > { %v1670_v29 = vsel %vm1663_vm5, %v1653_v15, %v1596_v4 }
 0x257   : > { %v2186_v46 = vpack.c.bf16 %v1694_v48, %v1694_v48  ;;  %v1693_v63 = vadd.f32 %v2982_v26, %v1670_v29  ;;  %v1594_v10 = vpop.permute.xlu0 %1593  ;;  %v1831_v59 = vmul.f32 %v1694_v48, %v1694_v48  ;;  %v1798_v37 = vsel %vm1784_vm7, %v1694_v48, 0.0 }
 0x258   : > { %v1669_v43 = vsel %vm1663_vm5, %v1652_v45, %v1594_v10  ;;  %v1639_v29 = vsel %vm686_vm2, %v2893_v13, %v2961_v18 }
 0x259   : > { %1775 = vst.msk [vmem:[%s2995_s8 + $0x1c] sm:$0xf] %vm1767_vm6, %v2186_v46  ;;  %v2185_v7 = vpack.c.bf16 %v1693_v63, %v1693_v63  ;;  %v1592_v11 = vpop.permute.xlu1 %1591  ;;  %v1692_v36 = vadd.f32 %v2982_v26, %v1669_v43  ;;  %v1830_v27 = vmul.f32 %v1693_v63, %v1693_v63  ;;  %v1796_v61 = vsel %vm1784_vm7, %v1693_v63, 0.0 }
 0x25a   : > { %v1668_v49 = vsel %vm1663_vm5, %v1651_v31, %v1592_v11  ;;  %v1853_v14 = vsel %vm1784_vm7, %v1831_v59, 0.0 }
 0x25b   : > { %1774 = vst.msk [vmem:[%s2995_s8 + $0x18] sm:$0xf] %vm1767_vm6, %v2185_v7  ;;  %v1691_v21 = vadd.f32 %v2982_v26, %v1668_v49  ;;  %v1542_v50 = vpop.permute.xlu0 %1541  ;;  %v2184_v2 = vpack.c.bf16 %v1692_v36, %v1692_v36  ;;  %v1829_v23 = vmul.f32 %v1692_v36, %v1692_v36  ;;  %v1794_v3 = vsel %vm1784_vm7, %v1692_v36, 0.0 }
 0x25c   : > { %v1851_v22 = vsel %vm1784_vm7, %v1830_v27, 0.0  ;;  %v1658_v38 = vsel %vm728_vm4, %v1642_v32, %v1542_v50  ;;  %v1644_v49 = vsel %vm686_vm2, %v2909_v8, %v2975_v39 }
 0x25d   : > { %v2183_v25 = vpack.c.bf16 %v1691_v21, %v1691_v21  ;;  %v1792_v56 = vsel %vm1784_vm7, %v1691_v21, 0.0  ;;  %v1828_v19 = vmul.f32 %v1691_v21, %v1691_v21  ;;  %v1540_v52 = vpop.permute.xlu1 %1539  ;;  %1773 = vst.msk [vmem:[%s2995_s8 + $0x14] sm:$0xf] %vm1767_vm6, %v2184_v2  ;;  %v1849_v1 = vsel %vm1784_vm7, %v1829_v23, 0.0 }
 0x25e   : > { %v1793_v53 = vadd.f32 %v1792_v56, %v1791_v40  ;;  %v1641_v40 = vsel %vm686_vm2, %v2891_v5, %v2957_v20 }
 0x25f   : > { %1772 = vst.msk [vmem:[%s2995_s8 + $0x10] sm:$0xf] %vm1767_vm6, %v2183_v25  ;;  %v1847_v54 = vsel %vm1784_vm7, %v1828_v19, 0.0  ;;  %v1538_v51 = vpop.permute.xlu0 %1537  ;;  %v1657_v16 = vsel %vm728_vm4, %v1641_v40, %v1540_v52 }
 0x260   : > { %v1795_v58 = vadd.f32 %v1794_v3, %v1793_v53  ;;  %v1848_v42 = vadd.f32 %v1847_v54, %v1846_v55  ;;  %v1640_v55 = vsel %vm686_vm2, %v2897_v6, %v2959_v60 }
 0x261   : > { %v1536_v28 = vpop.permute.xlu1 %1535  ;;  %v1656_v20 = vsel %vm728_vm4, %v1640_v55, %v1538_v51 }
 0x262   : > { %v1850_v34 = vadd.f32 %v1849_v1, %v1848_v42  ;;  %v1797_v35 = vadd.f32 %v1796_v61, %v1795_v58  ;;  %v1655_v46 = vsel %vm728_vm4, %v1639_v29, %v1536_v28  ;;  %v1643_v1 = vsel %vm686_vm2, %v2905_v24, %v2972_v0 }
 0x263   : > { %v1606_v12 = vpop.permute.xlu0 %1605 }
 0x264   : > { %v1675_v62 = vsel %vm1663_vm5, %v1658_v38, %v1606_v12  ;;  %v1799_v41 = vadd.f32 %v1798_v37, %v1797_v35  ;;  %v1852_v44 = vadd.f32 %v1851_v22, %v1850_v34 }
 0x265   : > { %v1698_v57 = vadd.f32 %v2982_v26, %v1675_v62  ;;  %v1604_v47 = vpop.permute.xlu1 %1603 }
 0x266   : > { %v1674_v15 = vsel %vm1663_vm5, %v1657_v16, %v1604_v47  ;;  %v1854_v5 = vadd.f32 %v1853_v14, %v1852_v44 }
 0x267   : > { %v2190_v48 = vpack.c.bf16 %v1698_v57, %v1698_v57  ;;  %v1697_v4 = vadd.f32 %v2982_v26, %v1674_v15  ;;  %v1602_v9 = vpop.permute.xlu0 %1601  ;;  %v1835_v27 = vmul.f32 %v1698_v57, %v1698_v57  ;;  %v1806_v42 = vsel %vm1784_vm7, %v1698_v57, 0.0 }
 0x268   : > { %v1673_v45 = vsel %vm1663_vm5, %v1656_v20, %v1602_v9 }
 0x269   : > { %1779 = vst.msk [vmem:[%s2995_s8 + $0x2c] sm:$0xf] %vm1767_vm6, %v2190_v48  ;;  %v2189_v6 = vpack.c.bf16 %v1697_v4, %v1697_v4  ;;  %v1600_v60 = vpop.permute.xlu1 %1599  ;;  %v1696_v63 = vadd.f32 %v2982_v26, %v1673_v45  ;;  %v1834_v50 = vmul.f32 %v1697_v4, %v1697_v4  ;;  %v1804_v8 = vsel %vm1784_vm7, %v1697_v4, 0.0 }
 0x26a   : > { %v1672_v10 = vsel %vm1663_vm5, %v1655_v46, %v1600_v60  ;;  %v1861_v34 = vsel %vm1784_vm7, %v1835_v27, 0.0 }
 0x26b   : > { %1778 = vst.msk [vmem:[%s2995_s8 + $0x28] sm:$0xf] %vm1767_vm6, %v2189_v6  ;;  %v1695_v17 = vadd.f32 %v2982_v26, %v1672_v10  ;;  %v1546_v43 = vpop.permute.xlu0 %1545  ;;  %v2188_v13 = vpack.c.bf16 %v1696_v63, %v1696_v63  ;;  %v1833_v18 = vmul.f32 %v1696_v63, %v1696_v63  ;;  %v1802_v2 = vsel %vm1784_vm7, %v1696_v63, 0.0 }
 0x26c   : > { %v1660_v25 = vsel %vm728_vm4, %v1644_v49, %v1546_v43  ;;  %v1859_v59 = vsel %vm1784_vm7, %v1834_v50, 0.0 }
 0x26d   : > { %v2187_v31 = vpack.c.bf16 %v1695_v17, %v1695_v17  ;;  %v1800_v7 = vsel %vm1784_vm7, %v1695_v17, 0.0  ;;  %v1832_v11 = vmul.f32 %v1695_v17, %v1695_v17  ;;  %v1548_v36 = vpop.permute.xlu1 %1547  ;;  %1777 = vst.msk [vmem:[%s2995_s8 + $0x24] sm:$0xf] %vm1767_vm6, %v2188_v13  ;;  %v1857_v39 = vsel %vm1784_vm7, %v1833_v18, 0.0 }
 0x26e   : > { %v1801_v21 = vadd.f32 %v1800_v7, %v1799_v41  ;;  %v1661_v40 = vsel %vm728_vm4, %v2966_v30, %v1548_v36 }
 0x26f   : > { %1776 = vst.msk [vmem:[%s2995_s8 + $0x20] sm:$0xf] %vm1767_vm6, %v2187_v31  ;;  %v1855_v23 = vsel %vm1784_vm7, %v1832_v11, 0.0  ;;  %v1610_v56 = vpop.permute.xlu0 %1609 }
 0x270   : > { %v1803_v19 = vadd.f32 %v1802_v2, %v1801_v21  ;;  %v1856_v52 = vadd.f32 %v1855_v23, %v1854_v5  ;;  %v1677_v53 = vsel %vm1663_vm5, %v1660_v25, %v1610_v56 }
 0x271   : > { %v1700_v3 = vadd.f32 %v2982_v26, %v1677_v53  ;;  %v1544_v54 = vpop.permute.xlu1 %1543 }
 0x272   : > { %v1858_v51 = vadd.f32 %v1857_v39, %v1856_v52  ;;  %v1805_v58 = vadd.f32 %v1804_v8, %v1803_v19  ;;  %v1659_v35 = vsel %vm728_vm4, %v1643_v1, %v1544_v54 }
 0x273   : > { %v2192_v61 = vpack.c.bf16 %v1700_v3, %v1700_v3  ;;  %v1837_v62 = vmul.f32 %v1700_v3, %v1700_v3  ;;  %v1550_v24 = vpop.permute.xlu0 %1549  ;;  %v1810_v47 = vsel %vm1784_vm7, %v1700_v3, 0.0 }
 0x274   : > { %v1807_v28 = vadd.f32 %v1806_v42, %v1805_v58  ;;  %v1860_v32 = vadd.f32 %v1859_v59, %v1858_v51  ;;  %v1662_v30 = vsel %vm728_vm4, %v2970_v33, %v1550_v24 }
 0x275   : > { %1781 = vst.msk [vmem:[%s2995_s8 + $0x34] sm:$0xf] %vm1767_vm6, %v2192_v61  ;;  %v1608_v37 = vpop.permute.xlu1 %1607  ;;  %v1865_v48 = vsel %vm1784_vm7, %v1837_v62, 0.0 }
 0x276   : > { %v1676_v22 = vsel %vm1663_vm5, %v1659_v35, %v1608_v37  ;;  %v1862_v38 = vadd.f32 %v1861_v34, %v1860_v32 }
 0x277   : > { %v1699_v12 = vadd.f32 %v2982_v26, %v1676_v22 }
 0x279   : > { %v2191_v0 = vpack.c.bf16 %v1699_v12, %v1699_v12  ;;  %v1808_v41 = vsel %vm1784_vm7, %v1699_v12, 0.0  ;;  %v1836_v44 = vmul.f32 %v1699_v12, %v1699_v12  ;;  %v1612_v14 = vpop.permute.xlu1 %1611 }
 0x27a   : > { %v1809_v16 = vadd.f32 %v1808_v41, %v1807_v28  ;;  %v1678_v57 = vsel %vm1663_vm5, %v1661_v40, %v1612_v14 }
 0x27b   : > { %1780 = vst.msk [vmem:[%s2995_s8 + $0x30] sm:$0xf] %vm1767_vm6, %v2191_v0  ;;  %v1863_v55 = vsel %vm1784_vm7, %v1836_v44, 0.0  ;;  %v1701_v15 = vadd.f32 %v2982_v26, %v1678_v57 }
 0x27c   : > { %v1864_v5 = vadd.f32 %v1863_v55, %v1862_v38  ;;  %v1811_v20 = vadd.f32 %v1810_v47, %v1809_v16 }
 0x27d   : > { %v2193_v4 = vpack.c.bf16 %v1701_v15, %v1701_v15  ;;  %v1812_v9 = vsel %vm1784_vm7, %v1701_v15, 0.0  ;;  %v1838_v29 = vmul.f32 %v1701_v15, %v1701_v15  ;;  %v1614_v45 = vpop.permute.xlu1 %1613 }
 0x27e   : > { %v1813_v46 = vadd.f32 %v1812_v9, %v1811_v20  ;;  %v1866_v6 = vadd.f32 %v1865_v48, %v1864_v5  ;;  %v1679_v60 = vsel %vm1663_vm5, %v1662_v30, %v1614_v45 }
 0x27f   : > { %1782 = vst.msk [vmem:[%s2995_s8 + $0x38] sm:$0xf] %vm1767_vm6, %v2193_v4  ;;  %v1867_v33 = vsel %vm1784_vm7, %v1838_v29, 0.0  ;;  %v1702_v63 = vadd.f32 %v2982_v26, %v1679_v60 }
 0x280   : > { %v1868_v10 = vadd.f32 %v1867_v33, %v1866_v6 }
 0x281   : > { %v2194_v17 = vpack.c.bf16 %v1702_v63, %v1702_v63  ;;  %v1814_v43 = vsel %vm1784_vm7, %v1702_v63, 0.0  ;;  %v1839_v13 = vmul.f32 %v1702_v63, %v1702_v63 }
 0x282   : > { %v1815_v18 = vadd.f32 %v1814_v43, %v1813_v46 }
 0x283   : > { %1783 = vst.msk [vmem:[%s2995_s8 + $0x3c] sm:$0xf] %vm1767_vm6, %v2194_v17  ;;  %v1869_v31 = vsel %vm1784_vm7, %v1839_v13, 0.0 }
 0x284   : > { %v1816_v7 = vrot.slane %v1815_v18, 4  ;;  %v1870_v11 = vadd.f32 %v1869_v31, %v1868_v10 }
 0x286   : > { %v1817_v36 = vadd.f32 %v1816_v7, %v1815_v18  ;;  %v1871_v49 = vrot.slane %v1870_v11, 4 }
 0x288   : > { %v1818_v21 = vrot.slane %v1817_v36, 2  ;;  %v1872_v50 = vadd.f32 %v1871_v49, %v1870_v11 }
 0x28a   : > { %v1819_v26 = vadd.f32 %v1818_v21, %v1817_v36  ;;  %v1873_v2 = vrot.slane %v1872_v50, 2 }
 0x28c   : > { %v1820_v23 = vrot.slane %v1819_v26, 1  ;;  %v1874_v25 = vadd.f32 %v1873_v2, %v1872_v50 }
 0x28e   : > { %v1821_v56 = vadd.f32 %v1820_v23, %v1819_v26  ;;  %v1875_v19 = vrot.slane %v1874_v25, 1 }
 0x290   : > { %1823 = vst.msk [vmem:[%s401_s12] sm:$0x1] %vm1822_vm8, %v1821_v56  ;;  %v1876_v52 = vadd.f32 %v1875_v19, %v1874_v25 }
 0x292   : > { %1877 = vst.msk [vmem:[%s408_s15] sm:$0x1] %vm1822_vm8, %v1876_v52 }
 0x293 PF: > { %s17_s25 = sadd.s32 1, %s2415_s25   ;;  %s3170_s21 = smov %s2407_s23 }
 0x294   : > { %p14_p10 = scmp.ge.s32.totalorder %s17_s25, 6   ;;  %s3171_s22 = smov %s2411_s24 }
 0x295   : > { %s3172_s23 = smov %s3175_s26  ;;  %s3173_s24 = smov %s3179_s27 }
 0x296   :  { %16 = sbr.rel (!%p14_p10) target bundleno = 3 (0x3), region = 96 }

</bundles_post_ra>
